<compile_context>
chip_gen: v5e
topology: v5e:2x2
jax: 0.10.0
libtpu: 0.0.40
codegen_flags: <defaults>
</compile_context>

<pallas_src>
import functools

import jax
import jax.numpy as jnp
from jax import lax
from jax.experimental import pallas as pl
from jax.experimental.pallas import tpu as pltpu


def _inverted_residual_kernel(x_ref, w1_ref, b1_ref, wdw_ref, b2_ref,
                              w2_ref, b3_ref, o_ref, yp_ref, *,
                              stride, identity):
    """One batch element per grid step; full H, W and padded C resident in VMEM."""
    f32 = jnp.float32
    bf16 = jnp.bfloat16

    x = x_ref[0]                               # (H, W, Cin_p) f32
    H, W, Cin = x.shape
    Ch = w1_ref.shape[1]
    Cout = w2_ref.shape[1]

    # ---- pointwise1 (1x1 conv) + BN1 shift + ReLU6 -------------------------
    # BN1 scale pre-folded into w1; bf16 MXU operands, f32 accumulation.
    # reshape (H, W, C) -> (H*W, C) is layout-free (W is a sublane multiple).
    y = jnp.dot(x.reshape(H * W, Cin).astype(bf16), w1_ref[...],
                preferred_element_type=f32)
    y = jnp.clip(y + b1_ref[...], 0.0, 6.0).reshape(H, W, Ch)

    # ---- depthwise 3x3 (pad=1) + BN2 shift + ReLU6 -------------------------
    # Write y once into a zero-bordered VMEM scratch, then read 3 column-
    # shifted bands (one sublane shift each) and take 9 tile-aligned row
    # windows (leading-dim slices are free: the trailing (W, Ch) plane is
    # (8, 128)-tiled).  The border is re-zeroed every step (~9 vregs, trivial)
    # instead of being gated on pl.program_id(0)==0: with megacore sharding
    # each core owns a private scratch, so a first-step-only init would leave
    # the other core's border uninitialised.
    yp_ref[0, :, :] = jnp.zeros((W + 2, Ch), f32)
    yp_ref[H + 1, :, :] = jnp.zeros((W + 2, Ch), f32)
    yp_ref[1:H + 1, 0:1, :] = jnp.zeros((H, 1, Ch), f32)
    yp_ref[1:H + 1, W + 1:W + 2, :] = jnp.zeros((H, 1, Ch), f32)
    yp_ref[1:H + 1, 1:W + 1, :] = y

    wdw = wdw_ref[...]                         # (3, 3, Ch) f32, BN2 scale folded
    acc = None                                 # first tap initialises the accumulator
    for kw in range(3):
        band = yp_ref[:, kw:kw + W, :]         # (H+2, W, Ch)
        for kh in range(3):
            tap = band[kh:kh + H] * wdw[kh, kw]
            acc = tap if acc is None else acc + tap
    z = jnp.clip(acc + b2_ref[...], 0.0, 6.0)
    if stride > 1:                             # subsample once at the end
        # TODO(synk): for stride > 1 the full-resolution depthwise result is
        # computed then subsampled; computing only strided rows/cols would
        # save ~3/4 of the (already cheap) VPU work.
        z = z[::stride, ::stride, :]
    Ho, Wo = z.shape[0], z.shape[1]

    # ---- pointwise2 (1x1 conv) + BN3 shift ---------------------------------
    out = jnp.dot(z.reshape(Ho * Wo, Ch).astype(bf16), w2_ref[...],
                  preferred_element_type=f32)
    out = (out + b3_ref[...]).reshape(Ho, Wo, Cout)

    if identity:                               # in_dim == out_dim and stride == 1
        out = out + x                          # residual kept in f32

    o_ref[0] = out.astype(o_ref.dtype)


def _round_up(v, m):
    return (v + m - 1) // m * m


def inverted_residual(x_nhwc, params, *, stride):
    """x_nhwc: (N, H, W, Cin) float32.
    params: (w1, s1, b1, wdw, s2, b2, w2, s3, b3) where w1:(Cin,Ch),
    wdw:(3,3,Ch), w2:(Ch,Cout) and s*/b* are (C,) fused eval-mode BN
    scale/shift vectors.
    """
    (w1, s1, b1, wdw, s2, b2, w2, s3, b3) = params
    N, H, W, Cin = x_nhwc.shape
    Ch = w1.shape[1]
    Cout = w2.shape[1]
    Ho = (H + 2 - 3) // stride + 1
    Wo = (W + 2 - 3) // stride + 1
    identity = (Cin == Cout) and (stride == 1)

    LANE = 128
    Cin_p = _round_up(Cin, LANE)
    Ch_p = _round_up(Ch, LANE)
    Cout_p = _round_up(Cout, LANE)

    f32 = jnp.float32
    bf16 = jnp.bfloat16

    # Fold BN scales into the conv weights (eval mode) and zero-pad channels
    # to the 128-lane width; padded lanes stay exactly zero through the block.
    w1f = jnp.zeros((Cin_p, Ch_p), f32).at[:Cin, :Ch].set(w1 * s1[None, :])
    wdwf = jnp.zeros((3, 3, Ch_p), f32).at[:, :, :Ch].set(wdw * s2[None, None, :])
    w2f = jnp.zeros((Ch_p, Cout_p), f32).at[:Ch, :Cout].set(w2 * s3[None, :])
    b1p = jnp.zeros((1, Ch_p), f32).at[:, :Ch].set(b1[None, :])
    b2p = jnp.zeros((1, Ch_p), f32).at[:, :Ch].set(b2[None, :])
    b3p = jnp.zeros((1, Cout_p), f32).at[:, :Cout].set(b3[None, :])

    w1_bf = w1f.astype(bf16)                   # MXU-native operand dtype
    w2_bf = w2f.astype(bf16)
    wdwf = wdwf.astype(f32)                    # depthwise stays f32 (v5e-safe)

    xp = jnp.zeros((N, H, W, Cin_p), f32).at[..., :Cin].set(x_nhwc.astype(f32))

    kernel = functools.partial(_inverted_residual_kernel,
                               stride=stride, identity=identity)

    def full_spec(a):
        # Constant index_map -> same block every grid step -> weights stay
        # resident in VMEM (no per-step re-DMA).
        nd = a.ndim
        return pl.BlockSpec(a.shape, lambda n, _nd=nd: (0,) * _nd)

    out = pl.pallas_call(
        kernel,
        out_shape=jax.ShapeDtypeStruct((N, Ho, Wo, Cout_p), f32),
        grid_spec=pltpu.PrefetchScalarGridSpec(
            num_scalar_prefetch=0,
            grid=(N,),
            in_specs=[
                pl.BlockSpec((1, H, W, Cin_p), lambda n: (n, 0, 0, 0)),
                full_spec(w1_bf), full_spec(b1p),
                full_spec(wdwf), full_spec(b2p),
                full_spec(w2_bf), full_spec(b3p),
            ],
            out_specs=pl.BlockSpec((1, Ho, Wo, Cout_p), lambda n: (n, 0, 0, 0)),
            scratch_shapes=[pltpu.VMEM((H + 2, W + 2, Ch_p), f32)],
        ),
        compiler_params=pltpu.CompilerParams(
            dimension_semantics=("parallel",),
        ),
    )(xp, w1_bf, b1p, wdwf, b2p, w2_bf, b3p)

    return out[..., :Cout] if Cout_p != Cout else out


def _reference(x_nhwc, params, *, stride):
    """Pure-JAX f32 reference (mirrors PyTorch eval-mode forward)."""
    (w1, s1, b1, wdw, s2, b2, w2, s3, b3) = params
    f32 = jnp.float32
    x = x_nhwc.astype(f32)
    Cin, Ch = w1.shape
    Cout = w2.shape[1]
    identity = (Cin == Cout) and (stride == 1)

    y = jnp.einsum('nhwc,cd->nhwd', x, w1) * s1.reshape(1, 1, 1, -1) + b1.reshape(1, 1, 1, -1)
    y = jnp.clip(y, 0.0, 6.0)
    dw = wdw.reshape(3, 3, 1, Ch)              # HWIO, grouped
    z = lax.conv_general_dilated(
        y, dw, window_strides=(stride, stride), padding=((1, 1), (1, 1)),
        dimension_numbers=('NHWC', 'HWIO', 'NHWC'), feature_group_count=Ch)
    z = z * s2.reshape(1, 1, 1, -1) + b2.reshape(1, 1, 1, -1)
    z = jnp.clip(z, 0.0, 6.0)
    out = jnp.einsum('nhwc,cd->nhwd', z, w2) * s3.reshape(1, 1, 1, -1) + b3.reshape(1, 1, 1, -1)
    if identity:
        out = out + x
    return out


def _make_params(key, in_dim, out_dim, expand_dim):
    """Deterministic synthetic weights matching nn module shapes (eval BN fused)."""
    hidden = round(in_dim * expand_dim)
    eps = 1e-5
    ks = jax.random.split(key, 12)

    # torch pointwise (Co, Ci, 1, 1) -> (Ci, Co); depthwise (Ch, 1, 3, 3) -> (3, 3, Ch)
    w1 = 0.1 * jax.random.normal(ks[0], (in_dim, hidden), jnp.float32)
    wdw = 0.1 * jax.random.normal(ks[1], (3, 3, hidden), jnp.float32)
    w2 = 0.1 * jax.random.normal(ks[2], (hidden, out_dim), jnp.float32)

    def bn(kg, kb, km, kv, c):
        gamma = 1.0 + 0.1 * jax.random.normal(kg, (c,), jnp.float32)
        beta = 0.1 * jax.random.normal(kb, (c,), jnp.float32)
        mean = 0.1 * jax.random.normal(km, (c,), jnp.float32)
        var = jnp.abs(jax.random.normal(kv, (c,), jnp.float32)) + 0.5
        scale = gamma / jnp.sqrt(var + eps)
        shift = beta - mean * scale
        return scale, shift                    # (c,) vectors

    s1, b1 = bn(ks[3], ks[4], ks[5], ks[6], hidden)
    s2, b2 = bn(ks[7], ks[8], ks[9], ks[10], hidden)
    s3, b3 = bn(ks[11], ks[3], ks[5], ks[7], out_dim)  # reused keys, still deterministic
    return (w1, s1, b1, wdw, s2, b2, w2, s3, b3)


def _check(key, *, N, H, W, in_dim, out_dim, stride, expand_dim):
    kx, kp = jax.random.split(key)
    x_nhwc = jax.random.normal(kx, (N, H, W, in_dim), jnp.float32)
    params = _make_params(kp, in_dim, out_dim, expand_dim)

    out = inverted_residual(x_nhwc, params, stride=stride)
    out = jax.block_until_ready(out)

    ref = _reference(x_nhwc, params, stride=stride)
    assert out.shape == ref.shape, (out.shape, ref.shape)
    # bf16 MXU operands (f32 accumulation) relax numerics slightly vs the f32 reference.
    err = float(jnp.max(jnp.abs(out - ref)))
    assert jnp.allclose(out, ref, atol=3e-2, rtol=3e-2), err


if __name__ == "__main__":
    key = jax.random.PRNGKey(0)
    k1, k2 = jax.random.split(key)

    # InvertedResidual(in_dim=4, out_dim=4, stride=1, expand_dim=4) -> identity path
    _check(k1, N=2, H=16, W=16, in_dim=4, out_dim=4, stride=1, expand_dim=4)
    # InvertedResidual(in_dim=4, out_dim=8, stride=1, expand_dim=6) -> projection path
    _check(k2, N=2, H=16, W=16, in_dim=4, out_dim=8, stride=1, expand_dim=6)

    print("KERNEL_OK")
</pallas_src>

<mosaic_0001>
module attributes {stable_mosaic.version = 11 : i64} {
  func.func @_inverted_residual_kernel(%arg0: i32, %arg1: memref<1x16x16x128xf32, #tpu.memory_space<vmem>>, %arg2: memref<128x128xbf16, #tpu.memory_space<vmem>>, %arg3: memref<1x128xf32, #tpu.memory_space<vmem>>, %arg4: memref<3x3x128xf32, #tpu.memory_space<vmem>>, %arg5: memref<1x128xf32, #tpu.memory_space<vmem>>, %arg6: memref<128x128xbf16, #tpu.memory_space<vmem>>, %arg7: memref<1x128xf32, #tpu.memory_space<vmem>>, %arg8: memref<1x16x16x128xf32, #tpu.memory_space<vmem>>, %arg9: memref<18x18x128xf32, #tpu.memory_space<vmem>>) attributes {dimension_semantics = [#tpu.dimension_semantics<parallel>], iteration_bounds = array<i64: 2>, scalar_prefetch = 0 : i64, scratch_operands = 1 : i64, tpu.core_type = #tpu.core_type<tc>, window_params = [{transform_indices = @transform_0, window_bounds = array<i64: 1, 16, 16, 128>}, {pipeline_mode = #tpu.pipeline_mode<synchronous>, transform_indices = @transform_1, window_bounds = array<i64: 128, 128>}, {pipeline_mode = #tpu.pipeline_mode<synchronous>, transform_indices = @transform_2, window_bounds = array<i64: 1, 128>}, {pipeline_mode = #tpu.pipeline_mode<synchronous>, transform_indices = @transform_3, window_bounds = array<i64: 3, 3, 128>}, {pipeline_mode = #tpu.pipeline_mode<synchronous>, transform_indices = @transform_4, window_bounds = array<i64: 1, 128>}, {pipeline_mode = #tpu.pipeline_mode<synchronous>, transform_indices = @transform_5, window_bounds = array<i64: 128, 128>}, {pipeline_mode = #tpu.pipeline_mode<synchronous>, transform_indices = @transform_6, window_bounds = array<i64: 1, 128>}, {transform_indices = @transform_7, window_bounds = array<i64: 1, 16, 16, 128>}]} {
    %c0 = arith.constant 0 : index
    %c0_0 = arith.constant 0 : index
    %c0_1 = arith.constant 0 : index
    %c0_2 = arith.constant 0 : index
    %0 = vector.load %arg1[%c0, %c0_0, %c0_1, %c0_2] : memref<1x16x16x128xf32, #tpu.memory_space<vmem>>, vector<1x16x16x128xf32>
    %1 = vector.shape_cast %0 : vector<1x16x16x128xf32> to vector<16x16x128xf32>
    %2 = vector.shape_cast %1 : vector<16x16x128xf32> to vector<256x128xf32>
    %3 = arith.truncf %2 : vector<256x128xf32> to vector<256x128xbf16>
    %c0_3 = arith.constant 0 : index
    %c0_4 = arith.constant 0 : index
    %4 = vector.load %arg2[%c0_3, %c0_4] : memref<128x128xbf16, #tpu.memory_space<vmem>>, vector<128x128xbf16>
    %cst = arith.constant dense<0.000000e+00> : vector<256x128xf32>
    %5 = tpu.matmul %3, %4, %cst {dimension_numbers = #tpu.dot_dimension_numbers<[1], [0], [0], [1], [0, 0, 1, 1], [], []>} : vector<256x128xbf16>, vector<128x128xbf16>, vector<256x128xf32> -> vector<256x128xf32>
    %c0_5 = arith.constant 0 : index
    %c0_6 = arith.constant 0 : index
    %6 = vector.load %arg3[%c0_5, %c0_6] : memref<1x128xf32, #tpu.memory_space<vmem>>, vector<1x128xf32>
    %7 = vector.broadcast %6 : vector<1x128xf32> to vector<256x128xf32>
    %8 = arith.addf %5, %7 : vector<256x128xf32>
    %cst_7 = arith.constant 0.000000e+00 : f32
    %cst_8 = arith.constant 6.000000e+00 : f32
    %9 = vector.broadcast %cst_7 : f32 to vector<256x128xf32>
    %10 = arith.maximumf %9, %8 : vector<256x128xf32>
    %11 = vector.broadcast %cst_8 : f32 to vector<256x128xf32>
    %12 = arith.minimumf %11, %10 : vector<256x128xf32>
    %13 = vector.shape_cast %12 : vector<256x128xf32> to vector<16x16x128xf32>
    %cst_9 = arith.constant 0.000000e+00 : f32
    %14 = vector.broadcast %cst_9 : f32 to vector<18x128xf32>
    %c0_10 = arith.constant 0 : index
    %c0_11 = arith.constant 0 : index
    %c0_12 = arith.constant 0 : index
    %15 = vector.load %arg9[%c0_10, %c0_11, %c0_12] : memref<18x18x128xf32, #tpu.memory_space<vmem>>, vector<1x18x128xf32>
    %16 = vector.shape_cast %15 : vector<1x18x128xf32> to vector<18x128xf32>
    %17 = vector.shape_cast %14 : vector<18x128xf32> to vector<1x18x128xf32>
    tpu.vector_store %arg9[%c0_10, %c0_11, %c0_12], %17 {strides = array<i32>} : memref<18x18x128xf32, #tpu.memory_space<vmem>>, vector<1x18x128xf32>,
    %cst_13 = arith.constant 0.000000e+00 : f32
    %18 = vector.broadcast %cst_13 : f32 to vector<18x128xf32>
    %c17 = arith.constant 17 : index
    %c0_14 = arith.constant 0 : index
    %c0_15 = arith.constant 0 : index
    %19 = vector.load %arg9[%c17, %c0_14, %c0_15] : memref<18x18x128xf32, #tpu.memory_space<vmem>>, vector<1x18x128xf32>
    %20 = vector.shape_cast %19 : vector<1x18x128xf32> to vector<18x128xf32>
    %21 = vector.shape_cast %18 : vector<18x128xf32> to vector<1x18x128xf32>
    tpu.vector_store %arg9[%c17, %c0_14, %c0_15], %21 {strides = array<i32>} : memref<18x18x128xf32, #tpu.memory_space<vmem>>, vector<1x18x128xf32>,
    %cst_16 = arith.constant 0.000000e+00 : f32
    %22 = vector.broadcast %cst_16 : f32 to vector<16x1x128xf32>
    %c1 = arith.constant 1 : index
    %c0_17 = arith.constant 0 : index
    %c0_18 = arith.constant 0 : index
    %23 = vector.load %arg9[%c1, %c0_17, %c0_18] : memref<18x18x128xf32, #tpu.memory_space<vmem>>, vector<16x1x128xf32>
    tpu.vector_store %arg9[%c1, %c0_17, %c0_18], %22 {strides = array<i32>} : memref<18x18x128xf32, #tpu.memory_space<vmem>>, vector<16x1x128xf32>,
    %cst_19 = arith.constant 0.000000e+00 : f32
    %24 = vector.broadcast %cst_19 : f32 to vector<16x1x128xf32>
    %c1_20 = arith.constant 1 : index
    %c17_21 = arith.constant 17 : index
    %c0_22 = arith.constant 0 : index
    %25 = vector.load %arg9[%c1_20, %c17_21, %c0_22] : memref<18x18x128xf32, #tpu.memory_space<vmem>>, vector<16x1x128xf32>
    tpu.vector_store %arg9[%c1_20, %c17_21, %c0_22], %24 {strides = array<i32>} : memref<18x18x128xf32, #tpu.memory_space<vmem>>, vector<16x1x128xf32>,
    %c1_23 = arith.constant 1 : index
    %c1_24 = arith.constant 1 : index
    %c0_25 = arith.constant 0 : index
    %26 = vector.load %arg9[%c1_23, %c1_24, %c0_25] : memref<18x18x128xf32, #tpu.memory_space<vmem>>, vector<16x16x128xf32>
    tpu.vector_store %arg9[%c1_23, %c1_24, %c0_25], %13 {strides = array<i32>} : memref<18x18x128xf32, #tpu.memory_space<vmem>>, vector<16x16x128xf32>,
    %c0_26 = arith.constant 0 : index
    %c0_27 = arith.constant 0 : index
    %c0_28 = arith.constant 0 : index
    %27 = vector.load %arg4[%c0_26, %c0_27, %c0_28] : memref<3x3x128xf32, #tpu.memory_space<vmem>>, vector<3x3x128xf32>
    %c0_29 = arith.constant 0 : index
    %c0_30 = arith.constant 0 : index
    %c0_31 = arith.constant 0 : index
    %28 = vector.load %arg9[%c0_29, %c0_30, %c0_31] : memref<18x18x128xf32, #tpu.memory_space<vmem>>, vector<18x16x128xf32>
    %29 = vector.extract_strided_slice %28 {offsets = [0, 0, 0], sizes = [16, 16, 128], strides = [1, 1, 1]} : vector<18x16x128xf32> to vector<16x16x128xf32>
    %30 = vector.extract_strided_slice %27 {offsets = [0, 0, 0], sizes = [1, 1, 128], strides = [1, 1, 1]} : vector<3x3x128xf32> to vector<1x1x128xf32>
    %31 = vector.shape_cast %30 : vector<1x1x128xf32> to vector<128xf32>
    %32 = vector.shape_cast %31 : vector<128xf32> to vector<1x1x128xf32>
    %33 = vector.broadcast %32 : vector<1x1x128xf32> to vector<16x16x128xf32>
    %34 = arith.mulf %29, %33 : vector<16x16x128xf32>
    %35 = vector.extract_strided_slice %28 {offsets = [1, 0, 0], sizes = [16, 16, 128], strides = [1, 1, 1]} : vector<18x16x128xf32> to vector<16x16x128xf32>
    %36 = vector.extract_strided_slice %27 {offsets = [1, 0, 0], sizes = [1, 1, 128], strides = [1, 1, 1]} : vector<3x3x128xf32> to vector<1x1x128xf32>
    %37 = vector.shape_cast %36 : vector<1x1x128xf32> to vector<128xf32>
    %38 = vector.shape_cast %37 : vector<128xf32> to vector<1x1x128xf32>
    %39 = vector.broadcast %38 : vector<1x1x128xf32> to vector<16x16x128xf32>
    %40 = arith.mulf %35, %39 : vector<16x16x128xf32>
    %41 = arith.addf %34, %40 : vector<16x16x128xf32>
    %42 = vector.extract_strided_slice %28 {offsets = [2, 0, 0], sizes = [16, 16, 128], strides = [1, 1, 1]} : vector<18x16x128xf32> to vector<16x16x128xf32>
    %43 = vector.extract_strided_slice %27 {offsets = [2, 0, 0], sizes = [1, 1, 128], strides = [1, 1, 1]} : vector<3x3x128xf32> to vector<1x1x128xf32>
    %44 = vector.shape_cast %43 : vector<1x1x128xf32> to vector<128xf32>
    %45 = vector.shape_cast %44 : vector<128xf32> to vector<1x1x128xf32>
    %46 = vector.broadcast %45 : vector<1x1x128xf32> to vector<16x16x128xf32>
    %47 = arith.mulf %42, %46 : vector<16x16x128xf32>
    %48 = arith.addf %41, %47 : vector<16x16x128xf32>
    %c0_32 = arith.constant 0 : index
    %c1_33 = arith.constant 1 : index
    %c0_34 = arith.constant 0 : index
    %49 = vector.load %arg9[%c0_32, %c1_33, %c0_34] : memref<18x18x128xf32, #tpu.memory_space<vmem>>, vector<18x16x128xf32>
    %50 = vector.extract_strided_slice %49 {offsets = [0, 0, 0], sizes = [16, 16, 128], strides = [1, 1, 1]} : vector<18x16x128xf32> to vector<16x16x128xf32>
    %51 = vector.extract_strided_slice %27 {offsets = [0, 1, 0], sizes = [1, 1, 128], strides = [1, 1, 1]} : vector<3x3x128xf32> to vector<1x1x128xf32>
    %52 = vector.shape_cast %51 : vector<1x1x128xf32> to vector<128xf32>
    %53 = vector.shape_cast %52 : vector<128xf32> to vector<1x1x128xf32>
    %54 = vector.broadcast %53 : vector<1x1x128xf32> to vector<16x16x128xf32>
    %55 = arith.mulf %50, %54 : vector<16x16x128xf32>
    %56 = arith.addf %48, %55 : vector<16x16x128xf32>
    %57 = vector.extract_strided_slice %49 {offsets = [1, 0, 0], sizes = [16, 16, 128], strides = [1, 1, 1]} : vector<18x16x128xf32> to vector<16x16x128xf32>
    %58 = vector.extract_strided_slice %27 {offsets = [1, 1, 0], sizes = [1, 1, 128], strides = [1, 1, 1]} : vector<3x3x128xf32> to vector<1x1x128xf32>
    %59 = vector.shape_cast %58 : vector<1x1x128xf32> to vector<128xf32>
    %60 = vector.shape_cast %59 : vector<128xf32> to vector<1x1x128xf32>
    %61 = vector.broadcast %60 : vector<1x1x128xf32> to vector<16x16x128xf32>
    %62 = arith.mulf %57, %61 : vector<16x16x128xf32>
    %63 = arith.addf %56, %62 : vector<16x16x128xf32>
    %64 = vector.extract_strided_slice %49 {offsets = [2, 0, 0], sizes = [16, 16, 128], strides = [1, 1, 1]} : vector<18x16x128xf32> to vector<16x16x128xf32>
    %65 = vector.extract_strided_slice %27 {offsets = [2, 1, 0], sizes = [1, 1, 128], strides = [1, 1, 1]} : vector<3x3x128xf32> to vector<1x1x128xf32>
    %66 = vector.shape_cast %65 : vector<1x1x128xf32> to vector<128xf32>
    %67 = vector.shape_cast %66 : vector<128xf32> to vector<1x1x128xf32>
    %68 = vector.broadcast %67 : vector<1x1x128xf32> to vector<16x16x128xf32>
    %69 = arith.mulf %64, %68 : vector<16x16x128xf32>
    %70 = arith.addf %63, %69 : vector<16x16x128xf32>
    %c0_35 = arith.constant 0 : index
    %c2 = arith.constant 2 : index
    %c0_36 = arith.constant 0 : index
    %71 = vector.load %arg9[%c0_35, %c2, %c0_36] : memref<18x18x128xf32, #tpu.memory_space<vmem>>, vector<18x16x128xf32>
    %72 = vector.extract_strided_slice %71 {offsets = [0, 0, 0], sizes = [16, 16, 128], strides = [1, 1, 1]} : vector<18x16x128xf32> to vector<16x16x128xf32>
    %73 = vector.extract_strided_slice %27 {offsets = [0, 2, 0], sizes = [1, 1, 128], strides = [1, 1, 1]} : vector<3x3x128xf32> to vector<1x1x128xf32>
    %74 = vector.shape_cast %73 : vector<1x1x128xf32> to vector<128xf32>
    %75 = vector.shape_cast %74 : vector<128xf32> to vector<1x1x128xf32>
    %76 = vector.broadcast %75 : vector<1x1x128xf32> to vector<16x16x128xf32>
    %77 = arith.mulf %72, %76 : vector<16x16x128xf32>
    %78 = arith.addf %70, %77 : vector<16x16x128xf32>
    %79 = vector.extract_strided_slice %71 {offsets = [1, 0, 0], sizes = [16, 16, 128], strides = [1, 1, 1]} : vector<18x16x128xf32> to vector<16x16x128xf32>
    %80 = vector.extract_strided_slice %27 {offsets = [1, 2, 0], sizes = [1, 1, 128], strides = [1, 1, 1]} : vector<3x3x128xf32> to vector<1x1x128xf32>
    %81 = vector.shape_cast %80 : vector<1x1x128xf32> to vector<128xf32>
    %82 = vector.shape_cast %81 : vector<128xf32> to vector<1x1x128xf32>
    %83 = vector.broadcast %82 : vector<1x1x128xf32> to vector<16x16x128xf32>
    %84 = arith.mulf %79, %83 : vector<16x16x128xf32>
    %85 = arith.addf %78, %84 : vector<16x16x128xf32>
    %86 = vector.extract_strided_slice %71 {offsets = [2, 0, 0], sizes = [16, 16, 128], strides = [1, 1, 1]} : vector<18x16x128xf32> to vector<16x16x128xf32>
    %87 = vector.extract_strided_slice %27 {offsets = [2, 2, 0], sizes = [1, 1, 128], strides = [1, 1, 1]} : vector<3x3x128xf32> to vector<1x1x128xf32>
    %88 = vector.shape_cast %87 : vector<1x1x128xf32> to vector<128xf32>
    %89 = vector.shape_cast %88 : vector<128xf32> to vector<1x1x128xf32>
    %90 = vector.broadcast %89 : vector<1x1x128xf32> to vector<16x16x128xf32>
    %91 = arith.mulf %86, %90 : vector<16x16x128xf32>
    %92 = arith.addf %85, %91 : vector<16x16x128xf32>
    %c0_37 = arith.constant 0 : index
    %c0_38 = arith.constant 0 : index
    %93 = vector.load %arg5[%c0_37, %c0_38] : memref<1x128xf32, #tpu.memory_space<vmem>>, vector<1x128xf32>
    %94 = vector.shape_cast %93 : vector<1x128xf32> to vector<1x1x128xf32>
    %95 = vector.broadcast %94 : vector<1x1x128xf32> to vector<16x16x128xf32>
    %96 = arith.addf %92, %95 : vector<16x16x128xf32>
    %cst_39 = arith.constant 0.000000e+00 : f32
    %cst_40 = arith.constant 6.000000e+00 : f32
    %97 = vector.broadcast %cst_39 : f32 to vector<16x16x128xf32>
    %98 = arith.maximumf %97, %96 : vector<16x16x128xf32>
    %99 = vector.broadcast %cst_40 : f32 to vector<16x16x128xf32>
    %100 = arith.minimumf %99, %98 : vector<16x16x128xf32>
    %101 = vector.shape_cast %100 : vector<16x16x128xf32> to vector<256x128xf32>
    %102 = arith.truncf %101 : vector<256x128xf32> to vector<256x128xbf16>
    %c0_41 = arith.constant 0 : index
    %c0_42 = arith.constant 0 : index
    %103 = vector.load %arg6[%c0_41, %c0_42] : memref<128x128xbf16, #tpu.memory_space<vmem>>, vector<128x128xbf16>
    %cst_43 = arith.constant dense<0.000000e+00> : vector<256x128xf32>
    %104 = tpu.matmul %102, %103, %cst_43 {dimension_numbers = #tpu.dot_dimension_numbers<[1], [0], [0], [1], [0, 0, 1, 1], [], []>} : vector<256x128xbf16>, vector<128x128xbf16>, vector<256x128xf32> -> vector<256x128xf32>
    %c0_44 = arith.constant 0 : index
    %c0_45 = arith.constant 0 : index
    %105 = vector.load %arg7[%c0_44, %c0_45] : memref<1x128xf32, #tpu.memory_space<vmem>>, vector<1x128xf32>
    %106 = vector.broadcast %105 : vector<1x128xf32> to vector<256x128xf32>
    %107 = arith.addf %104, %106 : vector<256x128xf32>
    %108 = vector.shape_cast %107 : vector<256x128xf32> to vector<16x16x128xf32>
    %109 = arith.addf %108, %1 : vector<16x16x128xf32>
    %c0_46 = arith.constant 0 : index
    %c0_47 = arith.constant 0 : index
    %c0_48 = arith.constant 0 : index
    %c0_49 = arith.constant 0 : index
    %110 = vector.load %arg8[%c0_46, %c0_47, %c0_48, %c0_49] : memref<1x16x16x128xf32, #tpu.memory_space<vmem>>, vector<1x16x16x128xf32>
    %111 = vector.shape_cast %110 : vector<1x16x16x128xf32> to vector<16x16x128xf32>
    %112 = vector.shape_cast %109 : vector<16x16x128xf32> to vector<1x16x16x128xf32>
    tpu.vector_store %arg8[%c0_46, %c0_47, %c0_48, %c0_49], %112 {strides = array<i32>} : memref<1x16x16x128xf32, #tpu.memory_space<vmem>>, vector<1x16x16x128xf32>,
    return
  }
  func.func @transform_0(%arg0: i32) -> (i32, i32, i32, i32) {
    %c0_i32 = arith.constant 0 : i32
    %c0_i32_0 = arith.constant 0 : i32
    %c0_i32_1 = arith.constant 0 : i32
    %c0_i32_2 = arith.constant 0 : i32
    return %arg0, %c0_i32, %c0_i32_0, %c0_i32_1 : i32, i32, i32, i32
  }
  func.func @transform_1(%arg0: i32) -> (i32, i32) {
    %c0_i32 = arith.constant 0 : i32
    %c0_i32_0 = arith.constant 0 : i32
    %c0_i32_1 = arith.constant 0 : i32
    return %c0_i32, %c0_i32_0 : i32, i32
  }
  func.func @transform_2(%arg0: i32) -> (i32, i32) {
    %c0_i32 = arith.constant 0 : i32
    %c0_i32_0 = arith.constant 0 : i32
    %c0_i32_1 = arith.constant 0 : i32
    return %c0_i32, %c0_i32_0 : i32, i32
  }
  func.func @transform_3(%arg0: i32) -> (i32, i32, i32) {
    %c0_i32 = arith.constant 0 : i32
    %c0_i32_0 = arith.constant 0 : i32
    %c0_i32_1 = arith.constant 0 : i32
    %c0_i32_2 = arith.constant 0 : i32
    return %c0_i32, %c0_i32_0, %c0_i32_1 : i32, i32, i32
  }
  func.func @transform_4(%arg0: i32) -> (i32, i32) {
    %c0_i32 = arith.constant 0 : i32
    %c0_i32_0 = arith.constant 0 : i32
    %c0_i32_1 = arith.constant 0 : i32
    return %c0_i32, %c0_i32_0 : i32, i32
  }
  func.func @transform_5(%arg0: i32) -> (i32, i32) {
    %c0_i32 = arith.constant 0 : i32
    %c0_i32_0 = arith.constant 0 : i32
    %c0_i32_1 = arith.constant 0 : i32
    return %c0_i32, %c0_i32_0 : i32, i32
  }
  func.func @transform_6(%arg0: i32) -> (i32, i32) {
    %c0_i32 = arith.constant 0 : i32
    %c0_i32_0 = arith.constant 0 : i32
    %c0_i32_1 = arith.constant 0 : i32
    return %c0_i32, %c0_i32_0 : i32, i32
  }
  func.func @transform_7(%arg0: i32) -> (i32, i32, i32, i32) {
    %c0_i32 = arith.constant 0 : i32
    %c0_i32_0 = arith.constant 0 : i32
    %c0_i32_1 = arith.constant 0 : i32
    %c0_i32_2 = arith.constant 0 : i32
    return %arg0, %c0_i32, %c0_i32_0, %c0_i32_1 : i32, i32, i32, i32
  }
}

</mosaic_0001>

<bundles_post_ra>
// kernel: tpu_custom_call.1
= control target key start
LH: loop header
LB: loop body
LE: loop exit
PB: predicated region body
PF: predicated region fallthrough
CT: control target
= control target key end

     0   :  { %s3594_s0 = inlined_call_operand.hbm [shape: f32[2,16,16,128], index: 0, kind: input, shape index: {}]   ;;  %s3595_s1 = inlined_call_operand.hbm [shape: bf16[128,128], index: 1, kind: input, shape index: {}]   ;;  %s3596_s2 = inlined_call_operand.vmem [shape: f32[1,128], index: 2, kind: input, shape index: {}]   ;;  %s3597_s3 = inlined_call_operand.hbm [shape: f32[3,3,128], index: 3, kind: input, shape index: {}]   ;;  %s3598_s4 = inlined_call_operand.vmem [shape: f32[1,128], index: 4, kind: input, shape index: {}]   ;;  %s3599_s5 = inlined_call_operand.hbm [shape: bf16[128,128], index: 5, kind: input, shape index: {}]   ;;  %s3600_s6 = inlined_call_operand.vmem [shape: f32[1,128], index: 6, kind: input, shape index: {}]   ;;  %s3601_s7 = inlined_call_operand.hbm [shape: f32[2,16,16,128], index: 7, kind: output, shape index: {}]  }
   0x1   :  { %3631 = sst [smem:[#allocation46_spill]] %s3595_s1 }
   0x2   :  { %12 = vsyncpa [#allocation4], 0 }
   0x3   :  { %14 = vsyncpa [#allocation4 + $0x1], 0 }
   0x4   :  { %15 = vsyncpa [#allocation7], 0 }
   0x5   :  { %16 = vsyncpa [#allocation10], 0 }
   0x6   :  { %17 = vsyncpa [#allocation5], 0 }
   0x7   :  { %19 = vsyncpa [#allocation5 + $0x1], 0  ;;  %s2297_s24 = smov 0   ;;  %s2299_s25 = smov 0  }
   0x8   :  { %s2301_s26 = smov 0   ;;  %s2303_s27 = smov 0  }
   0x9 LB: > { %s2318_s28 = sadd.s32 4294967295, %s2245_s27   ;;  %s1809_s29 = sadd.s32 4294967294, %s2245_s27   ;;  %s2245_s27 = sphi %s2303_s27, %s3703_s27   ;;  %s2241_s26 = sphi %s2301_s26, %s3702_s26   ;;  %s2237_s25 = sphi %s2299_s25, %s3701_s25   ;;  %s2233_s24 = sphi %s2297_s24, %s3700_s24  }
   0xa   : > { %p45_p0 = scmp.ne.s32.totalorder %s2237_s25, %s2233_s24  ;;  %p46_p1 = scmp.eq.s32.totalorder %s2318_s28, 0 }
   0xb   : > { %p195_p2 = scmp.eq.s32.totalorder %s2318_s28, 1  ;;  %p201_p3 = scmp.eq.s32.totalorder %s1809_s29, 1 }
   0xc   : > { %p2327_p4 = por %p46_p1, %p45_p0  ;;  %p1810_p5 = scmp.ge.s32.totalorder %s2245_s27, 1 }
   0xd   : > { %p2332_p6 = por %p201_p3, %p45_p0  ;;  %p208_p7 = scmp.lt.s32.totalorder %s2245_s27, 3 }
   0xe   : > { %s3634_s1 = sld [smem:[#allocation46_spill]]  ;;  %s2247_s13 = smov [#allocation6]  }
   0xf   : > { %p2340_p8 = pnand %p1810_p5, %p208_p7  ;;  %s221_s14 = sshll.u32 %s2247_s13, 4  ;;  %s222_s14 = int_to_ptr.vmem [resolvable:$true] %s221_s14 }
  0x10   : > { %s236_s18 = sshll.u32 %s3597_s3, 4  ;;  %s2248_s19 = smov 64   ;;  %s237_s18 = int_to_ptr.hbm [resolvable:$true] %s236_s18 }
  0x11   : > { %p1943_p9 = pneg %p2340_p8  ;;  %s2249_s20 = smov 4  }
  0x12   : > { %s2250_s21 = smov [#allocation8]   ;;  %s253_s9 = sshll.u32 %s3599_s5, 4  ;;  %s254_s9 = int_to_ptr.hbm [resolvable:$true] %s253_s9 }
  0x13   : > { %p2348_p10 = pnand %p1943_p9, %p46_p1  ;;  %s238_s22 = sshll.u32 %s2250_s21, 4  ;;  %s239_s22 = int_to_ptr.vmem [resolvable:$true] %s238_s22 }
  0x14   : > { %s219_s11 = sshll.u32 %s3634_s1, 4  ;;  %s2251_s10 = smov [#allocation9]   ;;  %s220_s11 = int_to_ptr.hbm [resolvable:$true] %s219_s11 }
  0x15   : > { %1946 = dma.hbm_to_vmem [thread:$0]  (!%p2348_p10), %s220_s11, 1024, %s222_s14, [#allocation7], %s2248_s19, %s2248_s19, %s2249_s20  }
  0x16   : > { %1949 = dma.hbm_to_vmem [thread:$0]  (!%p2348_p10), %s237_s18, 192, %s239_s22, [#allocation7], %s2248_s19, %s2248_s19, %s2249_s20  }
  0x17   : > { %s255_s13 = sshll.u32 %s2251_s10, 4  ;;  %s2364_s11 = sadd.s32 1, %s2245_s27   ;;  %s256_s13 = int_to_ptr.vmem [resolvable:$true] %s255_s13 }
  0x18   : > { %1952 = dma.hbm_to_vmem [thread:$0]  (!%p2348_p10), %s254_s9, 1024, %s256_s13, [#allocation10], %s2248_s19, %s2248_s19, %s2249_s20  }
  0x19   : > { %s29_s14 = ssub.s32 %s2245_s27, %s2364_s11  ;;  %s32_s16 = sadd.s32 1, %s2241_s26 }
  0x1a   : > { %p30_p12 = scmp.eq.s32.totalorder %s29_s14, 0  ;;  %p39_p13 = scmp.ne.s32.totalorder %s2241_s26, %s2237_s25 }
  0x1b   : > { %p40_p0 = scmp.eq.s32.totalorder %s2245_s27, 0  ;;  %p1964_p3 = scmp.lt.s32.totalorder %s2245_s27, 2 }
  0x1c   : > { %s2376_s17 = scalar_select %p30_p12, %s2241_s26, %s32_s16  }
  0x1d   : > { %p41_p5 = por %p40_p0, %p39_p13  ;;  %p2380_p7 = por %p195_p2, %p39_p13 }
  0x1e   : > { %s272_s21 = sand.u32 1, %s2241_s26   ;;  %s1893_s22 = sshll.u32 %s2245_s27, 8 }
  0x1f   : > { %s1815_s15 = sshll.u32 %s272_s21, 8  ;;  %s281_s20 = scalar_lea.hbm %s3594_s0, %s1893_s22 }
  0x20   : > { %s282_s29 = sshll.u32 %s281_s20, 4  ;;  %s276_s9 = scalar_lea.vmem [#allocation3], %s1815_s15  ;;  %s283_s29 = int_to_ptr.hbm [resolvable:$true] %s282_s29 }
  0x21   : > { %s284_s10 = sshll.u32 %s276_s9, 4  ;;  %p2391_p9 = pnand %p1964_p3, %p41_p5  ;;  %s285_s10 = int_to_ptr.vmem [resolvable:$true] %s284_s10 }
  0x22   : > { %s273_s14 = scalar_lea.sflag [#allocation4], %s272_s21  ;;  %s2141_s16 = sshra.s32 %s283_s29, 4  ;;  %s2142_s16 = int_to_ptr.hbm [resolvable:$true] %s2141_s16 }
  0x23   : > { %s2143_s1 = scalar_lea.hbm %s2142_s16, 256  ;;  %p2145_p10 = pneg %p2391_p9 }
  0x24   : > { %p2144_p2 = scmp.ne.s32.totalorder %s2142_s16, %s2143_s1  ;;  %s2148_s23 = scalar_lea.hbm %s3594_s0, 512 }
  0x25   : > { %p2149_p0 = scmp.lt.s32.totalorder %s2142_s16, %s3594_s0  ;;  %p2150_p3 = scmp.lt.s32.totalorder %s2148_s23, %s2143_s1 }
  0x26   : > { %p2146_p12 = pnand %p2145_p10, %p2144_p2 }
  0x27   : > { %p2151_p5 = por %p2150_p3, %p2149_p0 }
  0x28   : > { %p2147_p13 = pneg %p2146_p12 }
  0x2a   : > { %p2152_p11 = pnand %p2151_p5, %p2147_p13 }
  0x2c   : > { %2155 = shalt.err (!%p2152_p11)
}
  0x2d   : > { %s2252_s21 = smov 128   ;;  %s2253_s9 = smov 8  }
  0x2e   : > { %1956 = dma.hbm_to_vmem [thread:$0]  (!%p2391_p9), %s283_s29, 4096, %s285_s10, %s273_s14, %s2252_s21, %s2252_s21, %s2253_s9  }
  0x2f   : > { %296 = sbr.rel (%p2340_p8) target bundleno = 643 (0x283), region = 48 }
  0x34   : > { %s2408_s22 = sand.u32 1, %s2237_s25  }
  0x35   : > { %s1819_s16 = sshll.u32 %s2408_s22, 8  ;;  %s299_s1 = scalar_lea.sflag [#allocation4], %s2408_s22 }
  0x36   : > { %s2414_s15 = scalar_lea.vmem [#allocation3], %s1819_s16 }
  0x37   : > { %2216 = dma.done.wait (%p2327_p4), %s299_s1, 4096  }
  0x38   : > { %2218 = vsyncadd (%p2327_p4), %s299_s1, 4294963200 }
  0x39   : > { %2220 = dma.done.wait (%p46_p1), [#allocation7], 1216  }
  0x3a   : > { %2222 = vsyncadd (%p46_p1), [#allocation7], 4294966080 }
  0x3b   : > { %2224 = dma.done.wait (%p46_p1), [#allocation10], 1024  }
  0x3c   : > { %2226 = vsyncadd (%p46_p1), [#allocation10], 4294966272  ;;  %v1901_v0 = vld [vmem:[#allocation6 + $0x38] sm:$0xff]  ;;  %v1900_v1 = vld [vmem:[#allocation6 + $0x30] sm:$0xff]  ;;  %v2254_v47 = vmov 0.0   ;;  %s3349_s9 = scalar_lea.vmem [#allocation11], %s1819_s16 }
  0x3d   : > { %465 = vmatpush.bf16.msra.mxu0 %v1901_v0  ;;  %1911 = vmatpush.bf16.msra.mxu2 %v1901_v0  ;;  %v1899_v2 = vld [vmem:[#allocation6 + $0x28] sm:$0xff]  ;;  %v1898_v3 = vld [vmem:[#allocation6 + $0x20] sm:$0xff]  ;;  %v1897_v4 = vld [vmem:[#allocation6 + $0x18] sm:$0xff]  ;;  %618 = vst [vmem:[#allocation2] sm:$0xff] %v2254_v47  ;;  %s1910_s16 = sshll.u32 %s2318_s28, 8  ;;  %s1704_s29 = sshll.u32 %s3349_s9, 4  ;;  %s1705_s29 = int_to_ptr.vmem [resolvable:$true] %s1704_s29 }
  0x3e   : > { %v1896_v5 = vld [vmem:[#allocation6 + $0x10] sm:$0xff]  ;;  %v1895_v6 = vld [vmem:[#allocation6 + $0x8] sm:$0xff]  ;;  %v1894_v7 = vld [vmem:[#allocation6] sm:$0xff]  ;;  %619 = vst [vmem:[#allocation2 + $0x8] sm:$0xff] %v2254_v47  ;;  %s1703_s12 = scalar_lea.hbm %s3601_s7, %s1910_s16  ;;  %s1692_s13 = scalar_lea.sflag [#allocation5], %s2408_s22 }
  0x3f   : > { %v349_v8 = vld [vmem:[%s2414_s15] sm:$0xff]  ;;  %v350_v9 = vld [vmem:[%s2414_s15 + $0x8] sm:$0xff]  ;;  %v351_v14 = vld [vmem:[%s2414_s15 + $0x10] sm:$0xff]  ;;  %620 = vst [vmem:[#allocation2 + $0x10] sm:$0x3] %v2254_v47  ;;  %s1706_s10 = sshll.u32 %s1703_s12, 4  ;;  %s1707_s10 = int_to_ptr.hbm [resolvable:$true] %s1706_s10 }
  0x40   : > { %v381_v10 = vpack.c.bf16 %v350_v9, %v349_v8  ;;  %v365_v11 = vld [vmem:[%s2414_s15 + $0x80] sm:$0xff]  ;;  %v366_v12 = vld [vmem:[%s2414_s15 + $0x88] sm:$0xff]  ;;  %v352_v15 = vld [vmem:[%s2414_s15 + $0x18] sm:$0xff]  ;;  %626 = vst [vmem:[#allocation2 + $0x18] sm:$0x1] %v2254_v47  ;;  %s2185_s28 = sshra.s32 %s1707_s10, 4  ;;  %s2186_s28 = int_to_ptr.hbm [resolvable:$true] %s2185_s28 }
  0x41   : > { %466 = vmatpush.bf16.msra.mxu0 %v1900_v1  ;;  %1912 = vmatpush.bf16.msra.mxu2 %v1900_v1  ;;  %v389_v13 = vpack.c.bf16 %v366_v12, %v365_v11  ;;  %v382_v16 = vpack.c.bf16 %v352_v15, %v351_v14  ;;  %v367_v17 = vld [vmem:[%s2414_s15 + $0x90] sm:$0xff]  ;;  %v368_v18 = vld [vmem:[%s2414_s15 + $0x98] sm:$0xff]  ;;  %v353_v20 = vld [vmem:[%s2414_s15 + $0x20] sm:$0xff]  ;;  %627 = vst [vmem:[#allocation2 + $0x30] sm:$0x1] %v2254_v47  ;;  %s2187_s14 = scalar_lea.hbm %s2186_s28, 256  ;;  %p2192_p11 = scmp.lt.s32.totalorder %s2186_s28, %s3601_s7 }
  0x42   : > { %v390_v19 = vpack.c.bf16 %v368_v18, %v367_v17  ;;  %v354_v21 = vld [vmem:[%s2414_s15 + $0x28] sm:$0xff]  ;;  %v369_v23 = vld [vmem:[%s2414_s15 + $0xa0] sm:$0xff]  ;;  %v355_v26 = vld [vmem:[%s2414_s15 + $0x30] sm:$0xff]  ;;  %642 = vst [vmem:[#allocation2 + $0x29] sm:$0x1] %v2254_v47  ;;  %p2188_p1 = scmp.ne.s32.totalorder %s2186_s28, %s2187_s14  ;;  %s2191_s20 = scalar_lea.hbm %s3601_s7, 512 }
  0x43   : > { %v383_v22 = vpack.c.bf16 %v354_v21, %v353_v20  ;;  %v370_v24 = vld [vmem:[%s2414_s15 + $0xa8] sm:$0xff]  ;;  %v356_v27 = vld [vmem:[%s2414_s15 + $0x38] sm:$0xff]  ;;  %v371_v29 = vld [vmem:[%s2414_s15 + $0xb0] sm:$0xff]  ;;  %643 = vst [vmem:[#allocation2 + $0x41] sm:$0x1] %v2254_v47  ;;  %p2193_p9 = scmp.lt.s32.totalorder %s2191_s20, %s2187_s14 }
  0x44   : > { %v391_v25 = vpack.c.bf16 %v370_v24, %v369_v23  ;;  %v384_v28 = vpack.c.bf16 %v356_v27, %v355_v26  ;;  %v372_v30 = vld [vmem:[%s2414_s15 + $0xb8] sm:$0xff]  ;;  %v357_v32 = vld [vmem:[%s2414_s15 + $0x40] sm:$0xff]  ;;  %v358_v33 = vld [vmem:[%s2414_s15 + $0x48] sm:$0xff]  ;;  %622 = vst [vmem:[#allocation2 + $0x198] sm:$0xff] %v2254_v47  ;;  %p2189_p4 = pnand %p2188_p1, %p2380_p7 }
  0x45   : > { %467 = vmatpush.bf16.msra.mxu0 %v1899_v2  ;;  %1913 = vmatpush.bf16.msra.mxu2 %v1899_v2  ;;  %v392_v31 = vpack.c.bf16 %v372_v30, %v371_v29  ;;  %v385_v34 = vpack.c.bf16 %v358_v33, %v357_v32  ;;  %v373_v35 = vld [vmem:[%s2414_s15 + $0xc0] sm:$0xff]  ;;  %v374_v36 = vld [vmem:[%s2414_s15 + $0xc8] sm:$0xff]  ;;  %v359_v38 = vld [vmem:[%s2414_s15 + $0x50] sm:$0xff]  ;;  %623 = vst [vmem:[#allocation2 + $0x1a0] sm:$0xff] %v2254_v47  ;;  %p2194_p2 = por %p2193_p9, %p2192_p11 }
  0x46   : > { %v393_v37 = vpack.c.bf16 %v374_v36, %v373_v35  ;;  %v360_v39 = vld [vmem:[%s2414_s15 + $0x58] sm:$0xff]  ;;  %v375_v41 = vld [vmem:[%s2414_s15 + $0xd0] sm:$0xff]  ;;  %v361_v44 = vld [vmem:[%s2414_s15 + $0x60] sm:$0xff]  ;;  %624 = vst [vmem:[#allocation2 + $0x1a8] sm:$0x3] %v2254_v47  ;;  %p2190_p8 = pneg %p2189_p4 }
  0x47   : > { %v386_v40 = vpack.c.bf16 %v360_v39, %v359_v38  ;;  %v376_v42 = vld [vmem:[%s2414_s15 + $0xd8] sm:$0xff]  ;;  %v362_v45 = vld [vmem:[%s2414_s15 + $0x68] sm:$0xff]  ;;  %v377_v48 = vld [vmem:[%s2414_s15 + $0xe0] sm:$0xff]  ;;  %628 = vst [vmem:[#allocation2 + $0x48] sm:$0x1] %v2254_v47 }
  0x48   : > { %v394_v43 = vpack.c.bf16 %v376_v42, %v375_v41  ;;  %v387_v46 = vpack.c.bf16 %v362_v45, %v361_v44  ;;  %v378_v49 = vld [vmem:[%s2414_s15 + $0xe8] sm:$0xff]  ;;  %v363_v51 = vld [vmem:[%s2414_s15 + $0x70] sm:$0xff]  ;;  %v364_v52 = vld [vmem:[%s2414_s15 + $0x78] sm:$0xff]  ;;  %629 = vst [vmem:[#allocation2 + $0x60] sm:$0x1] %v2254_v47  ;;  %p2195_p10 = pnand %p2194_p2, %p2190_p8 }
  0x49   : > { %468 = vmatpush.bf16.msra.mxu0 %v1898_v3  ;;  %1914 = vmatpush.bf16.msra.mxu2 %v1898_v3  ;;  %v395_v50 = vpack.c.bf16 %v378_v49, %v377_v48  ;;  %v388_v53 = vpack.c.bf16 %v364_v52, %v363_v51  ;;  %630 = vst [vmem:[#allocation2 + $0x78] sm:$0x1] %v2254_v47  ;;  %v379_v54 = vld [vmem:[%s2414_s15 + $0xf0] sm:$0xff]  ;;  %v380_v55 = vld [vmem:[%s2414_s15 + $0xf8] sm:$0xff]  ;;  %v1909_v58 = vld [vmem:[#allocation9 + $0x38] sm:$0xff] }
  0x4a   : > { %631 = vst [vmem:[#allocation2 + $0x90] sm:$0x1] %v2254_v47  ;;  %v396_v56 = vpack.c.bf16 %v380_v55, %v379_v54  ;;  %v2485_v57 = vld [vmem:[%s3596_s2] ss:$0 sm:$0xff]  ;;  %1538 = vmatpush.bf16.msra.mxu1 %v1909_v58  ;;  %1919 = vmatpush.bf16.msra.mxu3 %v1909_v58  ;;  %v1908_v61 = vld [vmem:[#allocation9 + $0x30] sm:$0xff]  ;;  %v1907_v0 = vld [vmem:[#allocation9 + $0x28] sm:$0xff] }
  0x4b   : > { %632 = vst [vmem:[#allocation2 + $0xa8] sm:$0x1] %v2254_v47  ;;  %v1906_v3 = vld [vmem:[#allocation9 + $0x20] sm:$0xff]  ;;  %v1903_v14 = vld [vmem:[#allocation9 + $0x8] sm:$0xff]  ;;  %v691_v15 = vld [vmem:[#allocation8 + $0x4] sm:$0x7] }
  0x4c   : > { %633 = vst [vmem:[#allocation2 + $0xc0] sm:$0x1] %v2254_v47  ;;  %v2518_v18 = vperm.slane %v691_v15, 0  ;;  %v1902_v24 = vld [vmem:[#allocation9] sm:$0xff]  ;;  %v2534_v35 = vperm.slane %v691_v15, 1  ;;  %v893_v54 = vld [vmem:[#allocation2 + $0x9] sm:$0xff] }
  0x4d   : > { %469 = vmatpush.bf16.msra.mxu0 %v1897_v4  ;;  %1915 = vmatpush.bf16.msra.mxu2 %v1897_v4  ;;  %634 = vst [vmem:[#allocation2 + $0xd8] sm:$0x1] %v2254_v47  ;;  %v1123_v48 = vld [vmem:[#allocation2 + $0x2] sm:$0xff]  ;;  %v2552_v55 = vperm.slane %v691_v15, 2 }
  0x4e   : > { %635 = vst [vmem:[#allocation2 + $0xf0] sm:$0x1] %v2254_v47  ;;  %1539 = vmatpush.bf16.msra.mxu1 %v1908_v61  ;;  %1920 = vmatpush.bf16.msra.mxu3 %v1908_v61 }
  0x4f   : > { %636 = vst [vmem:[#allocation2 + $0x108] sm:$0x1] %v2254_v47 }
  0x50   : > { %637 = vst [vmem:[#allocation2 + $0x120] sm:$0x1] %v2254_v47 }
  0x51   : > { %470 = vmatpush.bf16.msra.mxu0 %v1896_v5  ;;  %1916 = vmatpush.bf16.msra.mxu2 %v1896_v5  ;;  %638 = vst [vmem:[#allocation2 + $0x138] sm:$0x1] %v2254_v47 }
  0x52   : > { %639 = vst [vmem:[#allocation2 + $0x150] sm:$0x1] %v2254_v47  ;;  %1540 = vmatpush.bf16.msra.mxu1 %v1907_v0  ;;  %1921 = vmatpush.bf16.msra.mxu3 %v1907_v0 }
  0x53   : > { %640 = vst [vmem:[#allocation2 + $0x168] sm:$0x1] %v2254_v47 }
  0x54   : > { %641 = vst [vmem:[#allocation2 + $0x180] sm:$0x1] %v2254_v47 }
  0x55   : > { %471 = vmatpush.bf16.msra.mxu0 %v1895_v6  ;;  %1917 = vmatpush.bf16.msra.mxu2 %v1895_v6  ;;  %644 = vst [vmem:[#allocation2 + $0x59] sm:$0x1] %v2254_v47  ;;  %v1905_v6 = vld [vmem:[#allocation9 + $0x18] sm:$0xff] }
  0x56   : > { %645 = vst [vmem:[#allocation2 + $0x71] sm:$0x1] %v2254_v47  ;;  %1541 = vmatpush.bf16.msra.mxu1 %v1906_v3  ;;  %1922 = vmatpush.bf16.msra.mxu3 %v1906_v3 }
  0x57   : > { %646 = vst [vmem:[#allocation2 + $0x89] sm:$0x1] %v2254_v47 }
  0x58   : > { %647 = vst [vmem:[#allocation2 + $0xa1] sm:$0x1] %v2254_v47 }
  0x59   : > { %472 = vmatpush.bf16.msra.mxu0 %v1894_v7  ;;  %1918 = vmatpush.bf16.msra.mxu2 %v1894_v7  ;;  %648 = vst [vmem:[#allocation2 + $0xb9] sm:$0x1] %v2254_v47 }
  0x5a   : > { %649 = vst [vmem:[#allocation2 + $0xd1] sm:$0x1] %v2254_v47  ;;  %1542 = vmatpush.bf16.msra.mxu1 %v1905_v6  ;;  %1923 = vmatpush.bf16.msra.mxu3 %v1905_v6 }
  0x5b   : > { %650 = vst [vmem:[#allocation2 + $0xe9] sm:$0x1] %v2254_v47 }
  0x5c   : > { %473 = vmatmul.bf16.vlgmr.msra.gmra.mxu0 %v381_v10  ;;  %513 = vmatmul.bf16.vlgmr.msra.gmra.mxu2 %v389_v13  ;;  %651 = vst [vmem:[#allocation2 + $0x101] sm:$0x1] %v2254_v47  ;;  %v1904_v10 = vld [vmem:[#allocation9 + $0x10] sm:$0xff] }
  0x5d   : > { %652 = vst [vmem:[#allocation2 + $0x119] sm:$0x1] %v2254_v47  ;;  %v690_v13 = vld [vmem:[#allocation8] sm:$0x7] }
  0x5e   : > { %653 = vst [vmem:[#allocation2 + $0x131] sm:$0x1] %v2254_v47  ;;  %1543 = vmatpush.bf16.msra.mxu1 %v1904_v10  ;;  %1924 = vmatpush.bf16.msra.mxu3 %v1904_v10  ;;  %v2530_v33 = vperm.slane %v690_v13, 1  ;;  %v2548_v49 = vperm.slane %v690_v13, 2  ;;  %v1124_v10 = vld [vmem:[#allocation2 + $0xa] sm:$0xff] }
  0x5f   : > { %654 = vst [vmem:[#allocation2 + $0x149] sm:$0x1] %v2254_v47 }
  0x60   : > { %655 = vst [vmem:[#allocation2 + $0x161] sm:$0x1] %v2254_v47 }
  0x61   : > { %656 = vst [vmem:[#allocation2 + $0x179] sm:$0x1] %v2254_v47 }
  0x62   : > { %657 = vst [vmem:[#allocation2 + $0x191] sm:$0x1] %v2254_v47  ;;  %1544 = vmatpush.bf16.msra.mxu1 %v1903_v14  ;;  %1925 = vmatpush.bf16.msra.mxu3 %v1903_v14 }
  0x66   : > { %1545 = vmatpush.bf16.msra.mxu1 %v1902_v24  ;;  %1926 = vmatpush.bf16.msra.mxu3 %v1902_v24  ;;  %v1161_v24 = vmul.f32 %v2548_v49, %v1124_v10 }
  0x6c   : > { %478 = vmatmul.bf16.gmra.mxu0 %v382_v16  ;;  %518 = vmatmul.bf16.gmra.mxu2 %v390_v19  ;;  %v2514_v16 = vperm.slane %v690_v13, 0 }
  0x6e   : > { %v730_v26 = vmul.f32 0.0, %v2514_v16 }
  0x7c   : > { %483 = vmatmul.bf16.gmra.mxu0 %v383_v22  ;;  %523 = vmatmul.bf16.gmra.mxu2 %v391_v25  ;;  %v692_v25 = vld [vmem:[#allocation8 + $0x8] sm:$0x7] }
  0x7d   : > { %v2526_v30 = vperm.slane %v692_v25, 0  ;;  %v2544_v45 = vperm.slane %v692_v25, 1  ;;  %v2565_v6 = vperm.slane %v692_v25, 2 }
  0x8c   : > { %488 = vmatmul.bf16.gmra.mxu0 %v384_v28  ;;  %528 = vmatmul.bf16.gmra.mxu2 %v392_v31  ;;  %v892_v31 = vld [vmem:[#allocation2 + $0x1] sm:$0xff] }
  0x8d   : > { %v929_v39 = vmul.f32 %v2530_v33, %v892_v31 }
  0x9c   : > { %493 = vmatmul.bf16.gmra.mxu0 %v385_v34  ;;  %533 = vmatmul.bf16.gmra.mxu2 %v393_v37 }
  0xac   : > { %498 = vmatmul.bf16.gmra.mxu0 %v386_v40  ;;  %538 = vmatmul.bf16.gmra.mxu2 %v394_v43 }
  0xbc   : > { %503 = vmatmul.bf16.gmra.mxu0 %v387_v46  ;;  %543 = vmatmul.bf16.gmra.mxu2 %v395_v50 }
  0xcc   : > { %508 = vmatmul.bf16.gmra.mxu0 %v388_v53  ;;  %548 = vmatmul.bf16.gmra.mxu2 %v396_v56 }
  0xd9   : > { %v474_v59 = vpop.f32.mrf.mxu0 }
  0xda   : > { %v475_v60 = vadd.f32 %v2485_v57, %v474_v59 }
  0xdc   : > { %v554_v62 = vmax.f32 %v475_v60, 0.0  ;;  %v1160_v60 = vmul.f32 %v2548_v49, %v1123_v48 }
  0xde   : > { %v2496_v63 = vmin.f32 %v554_v62, 6.0 }
  0xdf   : > { %v514_v8 = vpop.f32.mrf.mxu2 }
  0xe0   : > { %658 = vst [vmem:[#allocation2 + $0x19] sm:$0xff] %v2496_v63  ;;  %v515_v17 = vadd.f32 %v2485_v57, %v514_v8  ;;  %v994_v47 = vmul.f32 %v2534_v35, %v2496_v63 }
  0xe1   : > { %v476_v1 = vpop.f32.mrf.mxu0 }
  0xe2   : > { %v477_v2 = vadd.f32 %v2485_v57, %v476_v1  ;;  %v570_v23 = vmax.f32 %v515_v17, 0.0 }
  0xe4   : > { %v555_v4 = vmax.f32 %v477_v2, 0.0  ;;  %v602_v28 = vmin.f32 %v570_v23, 6.0  ;;  %v930_v2 = vmul.f32 %v2530_v33, %v893_v54 }
  0xe6   : > { %v2507_v5 = vmin.f32 %v555_v4, 6.0  ;;  %674 = vst [vmem:[#allocation2 + $0xd9] sm:$0xff] %v602_v28 }
  0xe7   : > { %v516_v20 = vpop.f32.mrf.mxu2  ;;  %v2520_v21 = vld [vmem:[#allocation2 + $0x18] sm:$0xff] }
  0xe8   : > { %659 = vst [vmem:[#allocation2 + $0x21] sm:$0xff] %v2507_v5  ;;  %v763_v29 = vmul.f32 %v2518_v18, %v2520_v21  ;;  %v517_v36 = vadd.f32 %v2485_v57, %v516_v20 }
  0xe9   : > { %v479_v7 = vpop.f32.mrf.mxu0 }
  0xea   : > { %v480_v9 = vadd.f32 %v2485_v57, %v479_v7  ;;  %v795_v37 = vadd.f32 %v763_v29, %v730_v26  ;;  %v571_v43 = vmax.f32 %v517_v36, 0.0 }
  0xec   : > { %v556_v11 = vmax.f32 %v480_v9, 0.0  ;;  %v603_v51 = vmin.f32 %v571_v43, 6.0  ;;  %v2596_v43 = vld [vmem:[%s3598_s4] ss:$0 sm:$0xff] }
  0xee   : > { %v2512_v12 = vmin.f32 %v556_v11, 6.0  ;;  %675 = vst [vmem:[#allocation2 + $0xe1] sm:$0xff] %v603_v51 }
  0xef   : > { %v2541_v41 = vld [vmem:[#allocation2 + $0x20] sm:$0xff]  ;;  %v519_v46 = vpop.f32.mrf.mxu2 }
  0xf0   : > { %660 = vst [vmem:[#allocation2 + $0x31] sm:$0xff] %v2512_v12  ;;  %v764_v52 = vmul.f32 %v2518_v18, %v2541_v41  ;;  %v1059_v59 = vmul.f32 %v2544_v45, %v2512_v12  ;;  %v1125_v62 = vld [vmem:[#allocation2 + $0x1a] sm:$0xff]  ;;  %v520_v7 = vadd.f32 %v2485_v57, %v519_v46  ;;  %v1126_v36 = vld [vmem:[#allocation2 + $0x22] sm:$0xff] }
  0xf1   : > { %v481_v19 = vpop.f32.mrf.mxu0  ;;  %v1225_v13 = vmul.f32 %v2552_v55, %v1125_v62 }
  0xf2   : > { %v482_v22 = vadd.f32 %v2485_v57, %v481_v19  ;;  %v796_v0 = vadd.f32 %v764_v52, %v730_v26  ;;  %v572_v17 = vmax.f32 %v520_v7, 0.0  ;;  %v996_v7 = vmul.f32 %v2534_v35, %v2512_v12 }
  0xf4   : > { %v557_v27 = vmax.f32 %v482_v22, 0.0  ;;  %v995_v22 = vmul.f32 %v2534_v35, %v2507_v5  ;;  %v2575_v25 = vmin.f32 %v572_v17, 6.0 }
  0xf6   : > { %v2528_v32 = vmin.f32 %v557_v27, 6.0  ;;  %676 = vst [vmem:[#allocation2 + $0xf1] sm:$0xff] %v2575_v25 }
  0xf7   : > { %v2532_v34 = vld [vmem:[#allocation2 + $0x30] sm:$0xff]  ;;  %v521_v14 = vpop.f32.mrf.mxu2 }
  0xf8   : > { %661 = vst [vmem:[#allocation2 + $0x39] sm:$0xff] %v2528_v32  ;;  %v828_v38 = vmul.f32 %v2526_v30, %v2532_v34  ;;  %v765_v26 = vmul.f32 %v2518_v18, %v2532_v34  ;;  %v1060_v29 = vmul.f32 %v2544_v45, %v2528_v32 }
  0xf9   : > { %v484_v40 = vpop.f32.mrf.mxu0 }
  0xfa   : > { %v485_v42 = vadd.f32 %v2485_v57, %v484_v40  ;;  %v860_v44 = vadd.f32 %v828_v38, %v795_v37  ;;  %v732_v38 = vmul.f32 %v2514_v16, %v2520_v21  ;;  %v931_v21 = vmul.f32 %v2530_v33, %v2496_v63 }
  0xfc   : > { %v558_v50 = vmax.f32 %v485_v42, 0.0  ;;  %v961_v53 = vadd.f32 %v929_v39, %v860_v44  ;;  %v522_v44 = vadd.f32 %v2485_v57, %v521_v14  ;;  %v797_v48 = vadd.f32 %v765_v26, %v732_v38 }
  0xfe   : > { %v2554_v56 = vmin.f32 %v558_v50, 6.0  ;;  %v1026_v58 = vadd.f32 %v994_v47, %v961_v53  ;;  %v932_v50 = vmul.f32 %v2530_v33, %v2507_v5  ;;  %v1226_v53 = vmul.f32 %v2552_v55, %v1126_v36 }
  0xff   : > { %v2559_v61 = vld [vmem:[#allocation2 + $0x38] sm:$0xff]  ;;  %v573_v54 = vmax.f32 %v522_v44, 0.0  ;;  %v524_v63 = vpop.f32.mrf.mxu2 }
 0x100   : > { %662 = vst [vmem:[#allocation2 + $0x49] sm:$0xff] %v2554_v56  ;;  %v829_v1 = vmul.f32 %v2526_v30, %v2559_v61  ;;  %v1091_v3 = vadd.f32 %v1059_v59, %v1026_v58  ;;  %v2570_v15 = vld [vmem:[#allocation2 + $0x32] sm:$0xff]  ;;  %v2591_v40 = vld [vmem:[#allocation2 + $0x3a] sm:$0xff]  ;;  %v733_v59 = vmul.f32 %v2514_v16, %v2541_v41 }
 0x101   : > { %v486_v4 = vpop.f32.mrf.mxu0  ;;  %v1290_v31 = vmul.f32 %v2565_v6, %v2570_v15  ;;  %v1291_v58 = vmul.f32 %v2565_v6, %v2591_v40 }
 0x102   : > { %v487_v8 = vadd.f32 %v2485_v57, %v486_v4  ;;  %v861_v9 = vadd.f32 %v829_v1, %v796_v0  ;;  %v1192_v11 = vadd.f32 %v1160_v60, %v1091_v3  ;;  %v766_v60 = vmul.f32 %v2518_v18, %v2559_v61 }
 0x103   : > { %v2614_v3 = vmin.f32 %v573_v54, 6.0 }
 0x104   : > { %v559_v19 = vmax.f32 %v487_v8, 0.0  ;;  %v962_v20 = vadd.f32 %v930_v2, %v861_v9  ;;  %v1257_v23 = vadd.f32 %v1225_v13, %v1192_v11  ;;  %v1162_v8 = vmul.f32 %v2548_v49, %v1125_v62 }
 0x105   : > { %3639 = vst [vmem:[#allocation16_spill] sm:$0xff] %v2614_v3  ;;  %v1163_v9 = vmul.f32 %v2548_v49, %v1126_v36  ;;  %v997_v11 = vmul.f32 %v2534_v35, %v2528_v32  ;;  %v2627_v13 = vmul.f32 %v2530_v33, %v2512_v12  ;;  %v1061_v62 = vmul.f32 %v2544_v45, %v2554_v56 }
 0x106   : > { %v2579_v27 = vmin.f32 %v559_v19, 6.0  ;;  %v1027_v28 = vadd.f32 %v995_v22, %v962_v20  ;;  %v1322_v42 = vadd.f32 %v1290_v31, %v1257_v23  ;;  %677 = vst [vmem:[#allocation2 + $0xf9] sm:$0xff] %v2614_v3  ;;  %v734_v19 = vmul.f32 %v2514_v16, %v2532_v34 }
 0x107   : > { %v2586_v37 = vld [vmem:[#allocation2 + $0x48] sm:$0xff]  ;;  %v2637_v20 = vmul.f32 %v2530_v33, %v2528_v32  ;;  %v798_v12 = vadd.f32 %v766_v60, %v733_v59  ;;  %v1228_v34 = vmul.f32 %v2552_v55, %v2591_v40  ;;  %v525_v32 = vadd.f32 %v2485_v57, %v524_v63  ;;  %v526_v54 = vpop.f32.mrf.mxu2 }
 0x108   : > { %663 = vst [vmem:[#allocation2 + $0x51] sm:$0xff] %v2579_v27  ;;  %v1092_v39 = vadd.f32 %v1060_v29, %v1027_v28  ;;  %v830_v46 = vmul.f32 %v2526_v30, %v2586_v37  ;;  %v1358_v5 = vadd.f32 %v2596_v43, %v1322_v42  ;;  %v1227_v29 = vmul.f32 %v2552_v55, %v2570_v15 }
 0x109   : > { %v489_v47 = vpop.f32.mrf.mxu0  ;;  %v735_v42 = vmul.f32 %v2514_v16, %v2559_v61 }
 0x10a   : > { %v490_v51 = vadd.f32 %v2485_v57, %v489_v47  ;;  %v1193_v52 = vadd.f32 %v1161_v24, %v1092_v39  ;;  %v862_v0 = vadd.f32 %v830_v46, %v797_v48  ;;  %v1390_v23 = vmax.f32 %v1358_v5, 0.0 }
 0x10b   : > { %v574_v46 = vmax.f32 %v525_v32, 0.0  ;;  %v767_v47 = vmul.f32 %v2518_v18, %v2586_v37  ;;  %v998_v48 = vmul.f32 %v2534_v35, %v2554_v56 }
 0x10c   : > { %v560_v1 = vmax.f32 %v490_v51, 0.0  ;;  %v1258_v2 = vadd.f32 %v1226_v53, %v1193_v52  ;;  %v963_v4 = vadd.f32 %v931_v21, %v862_v0  ;;  %v1422_v51 = vmin.f32 %v1390_v23, 6.0 }
 0x10d   : > { %v2658_v61 = vmin.f32 %v574_v46, 6.0 }
 0x10e   : > { %v2620_v41 = vmin.f32 %v560_v1, 6.0  ;;  %v1323_v10 = vadd.f32 %v1291_v58, %v1258_v2  ;;  %v1028_v17 = vadd.f32 %v996_v7, %v963_v4  ;;  %v1062_v58 = vmul.f32 %v2544_v45, %v2579_v27 }
 0x10f   : > { %v2629_v14 = vld [vmem:[#allocation2 + $0x50] sm:$0xff]  ;;  %3640 = vst [vmem:[#allocation17_spill] sm:$0xff] %v2658_v61  ;;  %v527_v2 = vadd.f32 %v2485_v57, %v526_v54  ;;  %v1164_v7 = vmul.f32 %v2548_v49, %v2570_v15  ;;  %v736_v15 = vmul.f32 %v2514_v16, %v2586_v37 }
 0x110   : > { %664 = vst [vmem:[#allocation2 + $0x61] sm:$0xff] %v2620_v41  ;;  %v1359_v22 = vadd.f32 %v2596_v43, %v1323_v10  ;;  %v831_v24 = vmul.f32 %v2526_v30, %v2629_v14  ;;  %v1093_v28 = vadd.f32 %v1061_v62, %v1028_v17  ;;  %v1129_v39 = vld [vmem:[#allocation2 + $0x4a] sm:$0xff]  ;;  %v1130_v17 = vld [vmem:[#allocation2 + $0x52] sm:$0xff]  ;;  %v768_v62 = vmul.f32 %v2518_v18, %v2629_v14 }
 0x111   : > { %v491_v26 = vpop.f32.mrf.mxu0  ;;  %v1292_v60 = vmul.f32 %v2565_v6, %v1129_v39  ;;  %678 = vst [vmem:[#allocation2 + $0x109] sm:$0xff] %v2658_v61  ;;  %v1293_v32 = vmul.f32 %v2565_v6, %v1130_v17  ;;  %v1063_v37 = vmul.f32 %v2544_v45, %v2620_v41  ;;  %v737_v46 = vmul.f32 %v2514_v16, %v2629_v14 }
 0x112   : > { %v492_v31 = vadd.f32 %v2485_v57, %v491_v26  ;;  %v1391_v36 = vmax.f32 %v1359_v22, 0.0  ;;  %v863_v38 = vadd.f32 %v831_v24, %v798_v12  ;;  %v1194_v44 = vadd.f32 %v1162_v8, %v1093_v28 }
 0x113   : > { %v2668_v8 = vmul.f32 %v2548_v49, %v2591_v40  ;;  %v2680_v40 = vmul.f32 %v2530_v33, %v2554_v56  ;;  %v2684_v12 = vmul.f32 %v2530_v33, %v2579_v27  ;;  %v1229_v56 = vmul.f32 %v2552_v55, %v1129_v39 }
 0x114   : > { %v561_v21 = vmax.f32 %v492_v31, 0.0  ;;  %v1423_v52 = vmin.f32 %v1391_v36, 6.0  ;;  %v964_v53 = vadd.f32 %v932_v50, %v863_v38  ;;  %v1259_v59 = vadd.f32 %v1227_v29, %v1194_v44 }
 0x115   : > { %v799_v50 = vadd.f32 %v767_v47, %v734_v19  ;;  %v999_v19 = vmul.f32 %v2534_v35, %v2579_v27  ;;  %v800_v27 = vadd.f32 %v768_v62, %v735_v42  ;;  %v2709_v42 = vmul.f32 %v2548_v49, %v1129_v39 }
 0x116   : > { %v2660_v0 = vmin.f32 %v561_v21, 6.0  ;;  %v1454_v63 = vpack.c.bf16 %v1423_v52, %v1422_v51  ;;  %v1029_v1 = vadd.f32 %v997_v11, %v964_v53  ;;  %v1324_v5 = vadd.f32 %v1292_v60, %v1259_v59  ;;  %v529_v53 = vpop.f32.mrf.mxu2 }
 0x117   : > { %v701_v4 = vld [vmem:[#allocation2 + $0x60] sm:$0xff]  ;;  %v575_v11 = vmax.f32 %v527_v2, 0.0  ;;  %v2704_v21 = vmul.f32 %v2534_v35, %v2620_v41  ;;  %v2714_v14 = vmul.f32 %v2548_v49, %v1130_v17  ;;  %v2718_v59 = vmul.f32 %v2530_v33, %v2620_v41 }
 0x118   : > { %665 = vst [vmem:[#allocation2 + $0x69] sm:$0xff] %v2660_v0  ;;  %1546 = vmatmul.bf16.vlgmr.msra.gmra.mxu1 %v1454_v63  ;;  %v1094_v10 = vadd.f32 %v1062_v58, %v1029_v1  ;;  %v832_v22 = vmul.f32 %v2526_v30, %v701_v4  ;;  %v1360_v31 = vadd.f32 %v2596_v43, %v1324_v5 }
 0x119   : > { %v494_v23 = vpop.f32.mrf.mxu0  ;;  %v2687_v28 = vmin.f32 %v575_v11, 6.0  ;;  %v769_v47 = vmul.f32 %v2518_v18, %v701_v4  ;;  %v1064_v58 = vmul.f32 %v2544_v45, %v2660_v0  ;;  %v2725_v1 = vmul.f32 %v2534_v35, %v2660_v0 }
 0x11a   : > { %v495_v24 = vadd.f32 %v2485_v57, %v494_v23  ;;  %v1195_v26 = vadd.f32 %v1163_v9, %v1094_v10  ;;  %v864_v29 = vadd.f32 %v832_v22, %v799_v50  ;;  %v2697_v9 = vmul.f32 %v2552_v55, %v1130_v17 }
 0x11b   : > { %3641 = vst [vmem:[#allocation18_spill] sm:$0xff] %v2687_v28  ;;  %v530_v5 = vadd.f32 %v2485_v57, %v529_v53  ;;  %v801_v10 = vadd.f32 %v769_v47, %v736_v15  ;;  %v2730_v41 = vmul.f32 %v2514_v16, %v701_v4 }
 0x11c   : > { %v562_v36 = vmax.f32 %v495_v24, 0.0  ;;  %v1260_v38 = vadd.f32 %v1228_v34, %v1195_v26  ;;  %679 = vst [vmem:[#allocation2 + $0x111] sm:$0xff] %v2687_v28  ;;  %v965_v44 = vadd.f32 %v2627_v13, %v864_v29  ;;  %v1392_v13 = vmax.f32 %v1360_v31, 0.0 }
 0x11d   : > { %v576_v29 = vmax.f32 %v530_v5, 0.0 }
 0x11e   : > { %v2706_v51 = vmin.f32 %v562_v36, 6.0  ;;  %v1325_v34 = vadd.f32 %v1293_v32, %v1260_v38  ;;  %v1030_v52 = vadd.f32 %v998_v48, %v965_v44  ;;  %v1424_v24 = vmin.f32 %v1392_v13, 6.0 }
 0x11f   : > { %v702_v54 = vld [vmem:[#allocation2 + $0x68] sm:$0xff]  ;;  %v2736_v32 = vmul.f32 %v2530_v33, %v2660_v0  ;;  %v2740_v38 = vmin.f32 %v576_v29, 6.0  ;;  %v531_v0 = vpop.f32.mrf.mxu2  ;;  %v2778_v29 = vld [vmem:[#allocation2 + $0xf8] sm:$0xff] }
 0x120   : > { %666 = vst [vmem:[#allocation2 + $0x79] sm:$0xff] %v2706_v51  ;;  %v1361_v48 = vadd.f32 %v2596_v43, %v1325_v34  ;;  %v833_v60 = vmul.f32 %v2526_v30, %v702_v54  ;;  %v1095_v39 = vadd.f32 %v1063_v37, %v1030_v52  ;;  %v1131_v63 = vld [vmem:[#allocation2 + $0x62] sm:$0xff]  ;;  %v770_v50 = vmul.f32 %v2518_v18, %v702_v54  ;;  %v1132_v22 = vld [vmem:[#allocation2 + $0x6a] sm:$0xff] }
 0x121   : > { %v496_v2 = vpop.f32.mrf.mxu0  ;;  %v1294_v26 = vmul.f32 %v2565_v6, %v1131_v63  ;;  %v1295_v36 = vmul.f32 %v2565_v6, %v1132_v22  ;;  %3642 = vst [vmem:[#allocation19_spill] sm:$0xff] %v2740_v38  ;;  %v532_v53 = vadd.f32 %v2485_v57, %v531_v0  ;;  %v2752_v13 = vmul.f32 %v2552_v55, %v1132_v22 }
 0x122   : > { %v497_v17 = vadd.f32 %v2485_v57, %v496_v2  ;;  %v1393_v11 = vmax.f32 %v1361_v48, 0.0  ;;  %v865_v62 = vadd.f32 %v833_v60, %v800_v27  ;;  %v1196_v23 = vadd.f32 %v1164_v7, %v1095_v39  ;;  %680 = vst [vmem:[#allocation2 + $0x121] sm:$0xff] %v2740_v38 }
 0x123   : > { %v2742_v27 = vadd.f32 %v770_v50, %v737_v46  ;;  %v1065_v7 = vmul.f32 %v2544_v45, %v2706_v51  ;;  %v2755_v46 = vmul.f32 %v2514_v16, %v702_v54  ;;  %v577_v2 = vmax.f32 %v532_v53, 0.0  ;;  %v2769_v54 = vld [vmem:[#allocation2 + $0xd8] sm:$0xff]  ;;  %3644 = vst [vmem:[#allocation21_spill] sm:$0xff] %v2778_v29 }
 0x124   : > { %v563_v31 = vmax.f32 %v497_v17, 0.0  ;;  %v1425_v37 = vmin.f32 %v1393_v11, 6.0  ;;  %v966_v15 = vadd.f32 %v2637_v20, %v865_v62  ;;  %v1261_v4 = vadd.f32 %v1229_v56, %v1196_v23 }
 0x125   : > { %v2749_v56 = vmul.f32 %v2552_v55, %v1131_v63  ;;  %v2761_v5 = vmul.f32 %v2534_v35, %v2706_v51  ;;  %v2764_v50 = vmul.f32 %v2548_v49, %v1131_v63  ;;  %v2767_v17 = vmul.f32 %v2548_v49, %v1132_v22 }
 0x126   : > { %v595_v44 = vmin.f32 %v563_v31, 6.0  ;;  %v1455_v47 = vpack.c.bf16 %v1425_v37, %v1424_v24  ;;  %v1031_v34 = vadd.f32 %v999_v19, %v966_v15  ;;  %v1326_v52 = vadd.f32 %v1294_v26, %v1261_v4  ;;  %v2774_v24 = vld [vmem:[#allocation2 + $0xe0] sm:$0xff]  ;;  %v2776_v26 = vld [vmem:[#allocation2 + $0xf0] sm:$0xff] }
 0x127   : > { %v703_v20 = vld [vmem:[#allocation2 + $0x78] sm:$0xff]  ;;  %3643 = vst [vmem:[#allocation20_spill] sm:$0xff] %v2776_v26  ;;  %v2780_v31 = vmin.f32 %v577_v2, 6.0  ;;  %v2787_v37 = vmul.f32 %v2530_v33, %v2706_v51  ;;  %v781_v51 = vmul.f32 %v2518_v18, %v2776_v26 }
 0x128   : > { %667 = vst [vmem:[#allocation2 + $0x81] sm:$0xff] %v595_v44  ;;  %1551 = vmatmul.bf16.gmra.mxu1 %v1455_v47  ;;  %v1096_v48 = vadd.f32 %v1064_v58, %v1031_v34  ;;  %v1362_v19 = vadd.f32 %v2596_v43, %v1326_v52  ;;  %v834_v60 = vmul.f32 %v2526_v30, %v703_v20 }
 0x129   : > { %v499_v39 = vpop.f32.mrf.mxu0  ;;  %v771_v23 = vmul.f32 %v2518_v18, %v703_v20  ;;  %3645 = vst [vmem:[#allocation22_spill] sm:$0xff] %v2780_v31  ;;  %v2783_v22 = vmul.f32 %v2544_v45, %v595_v44  ;;  %v2792_v4 = vmul.f32 %v2534_v35, %v595_v44  ;;  %v748_v47 = vmul.f32 %v2514_v16, %v2769_v54 }
 0x12a   : > { %v500_v58 = vadd.f32 %v2485_v57, %v499_v39  ;;  %v1197_v11 = vadd.f32 %v2668_v8, %v1096_v48  ;;  %v866_v62 = vadd.f32 %v834_v60, %v801_v10  ;;  %v1394_v63 = vmax.f32 %v1362_v19, 0.0  ;;  %681 = vst [vmem:[#allocation2 + $0x129] sm:$0xff] %v2780_v31  ;;  %v2805_v48 = vld [vmem:[#allocation2 + $0x108] sm:$0xff]  ;;  %v2807_v19 = vld [vmem:[#allocation2 + $0x110] sm:$0xff] }
 0x12b   : > { %v749_v34 = vmul.f32 %v2514_v16, %v2774_v24  ;;  %v782_v52 = vmul.f32 %v2518_v18, %v2778_v29  ;;  %v803_v53 = vadd.f32 %v771_v23, %v2730_v41  ;;  %3646 = vst [vmem:[#allocation23_spill] sm:$0xff] %v2805_v48  ;;  %v2810_v2 = vmul.f32 %v2514_v16, %v703_v20 }
 0x12c   : > { %v564_v8 = vmax.f32 %v500_v58, 0.0  ;;  %v1262_v10 = vadd.f32 %v2697_v9, %v1197_v11  ;;  %v967_v15 = vadd.f32 %v2680_v40, %v866_v62  ;;  %3647 = vst [vmem:[#allocation24_spill] sm:$0xff] %v2807_v19  ;;  %v1426_v60 = vmin.f32 %v1394_v63, 6.0 }
 0x12d   : > { %v2813_v58 = vmul.f32 %v2530_v33, %v595_v44  ;;  %v2815_v11 = vadd.f32 %v781_v51, %v748_v47  ;;  %v2825_v44 = vmul.f32 %v2526_v30, %v2805_v48  ;;  %v2829_v47 = vmul.f32 %v2526_v30, %v2807_v19 }
 0x12e   : > { %v596_v9 = vmin.f32 %v564_v8, 6.0  ;;  %v1327_v0 = vadd.f32 %v1295_v36, %v1262_v10  ;;  %v1032_v40 = vadd.f32 %v2704_v21, %v967_v15  ;;  %v534_v8 = vpop.f32.mrf.mxu2  ;;  %v2819_v10 = vadd.f32 %v782_v52, %v749_v34 }
 0x12f   : > { %v704_v39 = vld [vmem:[#allocation2 + $0x80] sm:$0xff]  ;;  %v535_v20 = vadd.f32 %v2485_v57, %v534_v8 }
 0x130   : > { %668 = vst [vmem:[#allocation2 + $0x91] sm:$0xff] %v596_v9  ;;  %v1363_v36 = vadd.f32 %v2596_v43, %v1327_v0  ;;  %v835_v21 = vmul.f32 %v2526_v30, %v704_v39  ;;  %v1097_v41 = vadd.f32 %v1065_v7, %v1032_v40  ;;  %v1133_v62 = vld [vmem:[#allocation2 + $0x7a] sm:$0xff]  ;;  %v1134_v23 = vld [vmem:[#allocation2 + $0x82] sm:$0xff]  ;;  %v772_v15 = vmul.f32 %v2518_v18, %v704_v39 }
 0x131   : > { %v501_v63 = vpop.f32.mrf.mxu0  ;;  %v1296_v52 = vmul.f32 %v2565_v6, %v1133_v62  ;;  %v1297_v40 = vmul.f32 %v2565_v6, %v1134_v23  ;;  %v578_v8 = vmax.f32 %v535_v20, 0.0  ;;  %v2837_v31 = vmul.f32 %v2544_v45, %v596_v9 }
 0x132   : > { %v502_v7 = vadd.f32 %v2485_v57, %v501_v63  ;;  %v1395_v51 = vmax.f32 %v1363_v36, 0.0  ;;  %v867_v0 = vadd.f32 %v835_v21, %v2742_v27  ;;  %v1198_v34 = vadd.f32 %v2709_v42, %v1097_v41 }
 0x133   : > { %v2841_v63 = vmin.f32 %v578_v8, 6.0  ;;  %v2844_v27 = vadd.f32 %v772_v15, %v2755_v46  ;;  %v2847_v42 = vmul.f32 %v2552_v55, %v1133_v62  ;;  %v2850_v36 = vmul.f32 %v2552_v55, %v1134_v23 }
 0x134   : > { %v565_v38 = vmax.f32 %v502_v7, 0.0  ;;  %v1427_v48 = vmin.f32 %v1395_v51, 6.0  ;;  %v968_v19 = vadd.f32 %v2684_v12, %v867_v0  ;;  %v1263_v28 = vadd.f32 %v2749_v56, %v1198_v34 }
 0x135   : > { %3648 = vst [vmem:[#allocation25_spill] sm:$0xff] %v2841_v63  ;;  %v2855_v56 = vmul.f32 %v2514_v16, %v704_v39  ;;  %v2858_v46 = vmul.f32 %v2534_v35, %v596_v9  ;;  %v2861_v15 = vmul.f32 %v2548_v49, %v1133_v62  ;;  %v2864_v51 = vmul.f32 %v2548_v49, %v1134_v23 }
 0x136   : > { %v597_v21 = vmin.f32 %v565_v38, 6.0  ;;  %v1456_v41 = vpack.c.bf16 %v1427_v48, %v1426_v60  ;;  %v1033_v20 = vadd.f32 %v2725_v1, %v968_v19  ;;  %v1328_v7 = vadd.f32 %v1296_v52, %v1263_v28  ;;  %682 = vst [vmem:[#allocation2 + $0x139] sm:$0xff] %v2841_v63  ;;  %v536_v38 = vpop.f32.mrf.mxu2  ;;  %v2905_v63 = vld [vmem:[#allocation2 + $0xd9] sm:$0xff] }
 0x137   : > { %v705_v12 = vld [vmem:[#allocation2 + $0x90] sm:$0xff]  ;;  %v537_v60 = vadd.f32 %v2485_v57, %v536_v38  ;;  %v2872_v62 = vmul.f32 %v2530_v33, %v596_v9  ;;  %v2876_v23 = vmul.f32 %v2518_v18, %v2769_v54  ;;  %v2888_v9 = vmul.f32 %v2518_v18, %v2774_v24 }
 0x138   : > { %669 = vst [vmem:[#allocation2 + $0x99] sm:$0xff] %v597_v21  ;;  %1556 = vmatmul.bf16.gmra.mxu1 %v1456_v41  ;;  %v1098_v1 = vadd.f32 %v2783_v22, %v1033_v20  ;;  %v1364_v28 = vadd.f32 %v2596_v43, %v1328_v7  ;;  %v836_v48 = vmul.f32 %v2526_v30, %v705_v12 }
 0x139   : > { %v504_v19 = vpop.f32.mrf.mxu0  ;;  %v773_v39 = vmul.f32 %v2518_v18, %v705_v12  ;;  %v579_v8 = vmax.f32 %v537_v60, 0.0  ;;  %v2881_v41 = vmul.f32 %v2544_v45, %v597_v21  ;;  %v2884_v20 = vmul.f32 %v2534_v35, %v597_v21  ;;  %3649 = vst [vmem:[#allocation26_spill] sm:$0xff] %v2888_v9 }
 0x13a   : > { %v505_v0 = vadd.f32 %v2485_v57, %v504_v19  ;;  %v1199_v22 = vadd.f32 %v2714_v14, %v1098_v1  ;;  %v1396_v34 = vmax.f32 %v1364_v28, 0.0  ;;  %v868_v52 = vadd.f32 %v836_v48, %v803_v53  ;;  %v2895_v53 = vld [vmem:[#allocation2 + $0xda] sm:$0xff] }
 0x13b   : > { %v2893_v14 = vadd.f32 %v773_v39, %v2810_v2  ;;  %3650 = vst [vmem:[#allocation27_spill] sm:$0xff] %v2895_v53  ;;  %v2897_v28 = vmin.f32 %v579_v8, 6.0  ;;  %v2900_v48 = vmul.f32 %v2514_v16, %v705_v12  ;;  %v2903_v60 = vmul.f32 %v2530_v33, %v597_v21  ;;  %v2912_v39 = vld [vmem:[#allocation2 + $0xe1] sm:$0xff] }
 0x13c   : > { %v566_v7 = vmax.f32 %v505_v0, 0.0  ;;  %v1264_v38 = vadd.f32 %v2752_v13, %v1199_v22  ;;  %v969_v19 = vadd.f32 %v2718_v59, %v868_v52  ;;  %v1428_v1 = vmin.f32 %v1396_v34, 6.0  ;;  %v2907_v0 = vld [vmem:[#allocation2 + $0xe2] sm:$0xff] }
 0x13d   : > { %3651 = vst [vmem:[#allocation28_spill] sm:$0xff] %v2897_v28  ;;  %v2916_v22 = vmul.f32 %v2534_v35, %v2905_v63  ;;  %v2921_v21 = vmul.f32 %v2534_v35, %v2912_v39  ;;  %v2925_v34 = vmul.f32 %v2544_v45, %v2575_v25 }
 0x13e   : > { %3652 = vst [vmem:[#allocation29_spill] sm:$0xff] %v2903_v60  ;;  %v2909_v13 = vmin.f32 %v566_v7, 6.0  ;;  %v1329_v59 = vadd.f32 %v1297_v40, %v1264_v38  ;;  %v1034_v2 = vadd.f32 %v2761_v5, %v969_v19  ;;  %v2929_v5 = vmul.f32 %v2544_v45, %v2614_v3 }
 0x13f   : > { %3653 = vst [vmem:[#allocation30_spill] sm:$0xff] %v2907_v0  ;;  %v706_v12 = vld [vmem:[#allocation2 + $0x98] sm:$0xff]  ;;  %v2933_v40 = vmul.f32 %v2552_v55, %v2895_v53 }
 0x140   : > { %3654 = vst [vmem:[#allocation31_spill] sm:$0xff] %v2916_v22  ;;  %v1365_v52 = vadd.f32 %v2596_v43, %v1329_v59  ;;  %v837_v8 = vmul.f32 %v2526_v30, %v706_v12  ;;  %v1099_v7 = vadd.f32 %v2837_v31, %v1034_v2  ;;  %v1135_v38 = vld [vmem:[#allocation2 + $0x92] sm:$0xff]  ;;  %v1136_v19 = vld [vmem:[#allocation2 + $0x9a] sm:$0xff]  ;;  %v2951_v59 = vmul.f32 %v2526_v30, %v2774_v24 }
 0x141   : > { %683 = vst [vmem:[#allocation2 + $0x141] sm:$0xff] %v2897_v28  ;;  %v539_v28 = vpop.f32.mrf.mxu2  ;;  %v1298_v61 = vmul.f32 %v2565_v6, %v1135_v38 }
 0x142   : > { %3655 = vst [vmem:[#allocation32_spill] sm:$0xff] %v2921_v21  ;;  %v2941_v21 = vmul.f32 %v2552_v55, %v2907_v0  ;;  %v540_v60 = vadd.f32 %v2485_v57, %v539_v28  ;;  %v1397_v2 = vmax.f32 %v1365_v52, 0.0  ;;  %v869_v9 = vadd.f32 %v837_v8, %v2844_v27 }
 0x143   : > { %3656 = vst [vmem:[#allocation33_spill] sm:$0xff] %v2925_v34  ;;  %v2947_v34 = vmul.f32 %v2526_v30, %v2769_v54  ;;  %v1299_v28 = vmul.f32 %v2565_v6, %v1136_v19  ;;  %v1069_v54 = vmul.f32 %v2544_v45, %v2909_v13  ;;  %v2971_v52 = vmul.f32 %v2552_v55, %v1136_v19 }
 0x144   : > { %3657 = vst [vmem:[#allocation34_spill] sm:$0xff] %v2929_v5  ;;  %v506_v5 = vpop.f32.mrf.mxu0  ;;  %v580_v22 = vmax.f32 %v540_v60, 0.0  ;;  %v970_v24 = vadd.f32 %v2736_v32, %v869_v9  ;;  %v2983_v9 = vmul.f32 %v2548_v49, %v1135_v38 }
 0x145   : > { %3658 = vst [vmem:[#allocation35_spill] sm:$0xff] %v2933_v40  ;;  %v774_v40 = vmul.f32 %v2518_v18, %v706_v12  ;;  %v507_v31 = vadd.f32 %v2485_v57, %v506_v5 }
 0x146   : > { %670 = vst [vmem:[#allocation2 + $0xa9] sm:$0xff] %v2909_v13  ;;  %v2962_v5 = vmin.f32 %v580_v22, 6.0  ;;  %v2986_v22 = vmul.f32 %v2548_v49, %v1136_v19 }
 0x147   : > { %3659 = vst [vmem:[#allocation36_spill] sm:$0xff] %v2941_v21  ;;  %v1200_v21 = vadd.f32 %v2764_v50, %v1099_v7  ;;  %v567_v3 = vmax.f32 %v507_v31, 0.0  ;;  %v2965_v27 = vadd.f32 %v774_v40, %v2855_v56  ;;  %v2968_v50 = vmul.f32 %v2552_v55, %v1135_v38 }
 0x148   : > { %3660 = vst [vmem:[#allocation37_spill] sm:$0xff] %v2947_v34  ;;  %v1429_v34 = vmin.f32 %v1397_v2, 6.0  ;;  %v1035_v7 = vadd.f32 %v2792_v4, %v970_v24  ;;  %v2980_v56 = vmul.f32 %v2534_v35, %v2909_v13  ;;  %v2995_v40 = vmul.f32 %v2526_v30, %v2776_v26  ;;  %v3004_v24 = vld [vmem:[#allocation2 + $0xf2] sm:$0xff] }
 0x149   : > { %3661 = vst [vmem:[#allocation38_spill] sm:$0xff] %v2951_v59  ;;  %v1265_v59 = vadd.f32 %v2847_v42, %v1200_v21  ;;  %v599_v60 = vmin.f32 %v567_v3, 6.0  ;;  %v2976_v42 = vmul.f32 %v2514_v16, %v706_v12  ;;  %v541_v4 = vpop.f32.mrf.mxu2  ;;  %v2999_v38 = vmul.f32 %v2526_v30, %v2778_v29 }
 0x14a   : > { %3662 = vst [vmem:[#allocation39_spill] sm:$0xff] %v2962_v5  ;;  %v1457_v8 = vpack.c.bf16 %v1429_v34, %v1428_v1  ;;  %v1100_v3 = vadd.f32 %v2881_v41, %v1035_v7  ;;  %v542_v21 = vadd.f32 %v2485_v57, %v541_v4  ;;  %v3014_v4 = vmul.f32 %v2565_v6, %v3004_v24 }
 0x14b   : > { %v1330_v31 = vadd.f32 %v1298_v61, %v1265_v59  ;;  %684 = vst [vmem:[#allocation2 + $0x151] sm:$0xff] %v2962_v5  ;;  %v3007_v7 = vmul.f32 %v2544_v45, %v599_v60 }
 0x14c   : > { %671 = vst [vmem:[#allocation2 + $0xb1] sm:$0xff] %v599_v60  ;;  %1561 = vmatmul.bf16.gmra.mxu1 %v1457_v8  ;;  %v509_v12 = vpop.f32.mrf.mxu0  ;;  %v1201_v19 = vadd.f32 %v2767_v17, %v1100_v3  ;;  %v581_v8 = vmax.f32 %v542_v21, 0.0  ;;  %v3021_v3 = vld [vmem:[#allocation2 + $0xfa] sm:$0xff] }
 0x14d   : > { %v707_v32 = vld [vmem:[#allocation2 + $0xa8] sm:$0xff]  ;;  %v1366_v61 = vadd.f32 %v2596_v43, %v1330_v31  ;;  %v510_v41 = vadd.f32 %v2485_v57, %v509_v12  ;;  %3663 = vst [vmem:[#allocation40_spill] sm:$0xff] %v3004_v24  ;;  %v3010_v31 = vmul.f32 %v2534_v35, %v599_v60  ;;  %v3027_v21 = vmul.f32 %v2565_v6, %v3021_v3 }
 0x14e   : > { %v838_v1 = vmul.f32 %v2526_v30, %v707_v32  ;;  %v775_v34 = vmul.f32 %v2518_v18, %v707_v32  ;;  %v1266_v12 = vadd.f32 %v2850_v36, %v1201_v19  ;;  %3664 = vst [vmem:[#allocation41_spill] sm:$0xff] %v3021_v3  ;;  %v3030_v29 = vmul.f32 %v2514_v16, %v707_v32 }
 0x14f   : > { %v1398_v59 = vmax.f32 %v1366_v61, 0.0  ;;  %v568_v5 = vmax.f32 %v510_v41, 0.0  ;;  %3666 = vst [vmem:[#allocation43_spill] sm:$0xff] %v3027_v21  ;;  %v3043_v19 = vmul.f32 %v2544_v45, %v2905_v63  ;;  %v878_v3 = vadd.f32 %v2825_v44, %v2815_v11 }
 0x150   : > { %v870_v2 = vadd.f32 %v838_v1, %v2893_v14  ;;  %v3019_v14 = vadd.f32 %v775_v34, %v2900_v48  ;;  %v3023_v1 = vmin.f32 %v581_v8, 6.0  ;;  %v1331_v26 = vadd.f32 %v1299_v28, %v1266_v12 }
 0x151   : > { %v1430_v61 = vmin.f32 %v1398_v59, 6.0  ;;  %v600_v41 = vmin.f32 %v568_v5, 6.0  ;;  %v3039_v34 = vmul.f32 %v2530_v33, %v599_v60  ;;  %v3047_v5 = vmul.f32 %v2544_v45, %v2912_v39 }
 0x152   : > { %v971_v17 = vadd.f32 %v2787_v37, %v870_v2  ;;  %3665 = vst [vmem:[#allocation42_spill] sm:$0xff] %v3023_v1  ;;  %v3035_v37 = vmul.f32 %v2530_v33, %v2909_v13  ;;  %v1367_v13 = vadd.f32 %v2596_v43, %v1331_v26  ;;  %v544_v2 = vpop.f32.mrf.mxu2  ;;  %v3057_v8 = vmul.f32 %v2565_v6, %v2907_v0 }
 0x153   : > { %685 = vst [vmem:[#allocation2 + $0x159] sm:$0xff] %v3023_v1  ;;  %v708_v48 = vld [vmem:[#allocation2 + $0xb0] sm:$0xff]  ;;  %v3065_v26 = vadd.f32 %v2829_v47, %v2819_v10 }
 0x154   : > { %v1036_v36 = vadd.f32 %v2858_v46, %v971_v17  ;;  %v3051_v46 = vmul.f32 %v2565_v6, %v2895_v53  ;;  %672 = vst [vmem:[#allocation2 + $0xc1] sm:$0xff] %v600_v41  ;;  %v839_v28 = vmul.f32 %v2526_v30, %v708_v48  ;;  %v1137_v60 = vld [vmem:[#allocation2 + $0xaa] sm:$0xff]  ;;  %v1138_v59 = vld [vmem:[#allocation2 + $0xb2] sm:$0xff]  ;;  %v511_v12 = vpop.f32.mrf.mxu0  ;;  %v545_v17 = vadd.f32 %v2485_v57, %v544_v2 }
 0x155   : > { %3668 = vst [vmem:[#allocation45_spill] sm:$0xff] %v3057_v8  ;;  %v776_v1 = vmul.f32 %v2518_v18, %v708_v48  ;;  %v1300_v8 = vmul.f32 %v2565_v6, %v1137_v60  ;;  %v1301_v2 = vmul.f32 %v2565_v6, %v1138_v59  ;;  %v1071_v53 = vmul.f32 %v2544_v45, %v600_v41 }
 0x156   : > { %3667 = vst [vmem:[#allocation44_spill] sm:$0xff] %v3051_v46  ;;  %v1101_v32 = vadd.f32 %v1069_v54, %v1036_v36  ;;  %v512_v54 = vadd.f32 %v2485_v57, %v511_v12  ;;  %v1399_v36 = vmax.f32 %v1367_v13, 0.0  ;;  %v871_v21 = vadd.f32 %v839_v28, %v2965_v27 }
 0x157   : > { %v582_v0 = vmax.f32 %v545_v17, 0.0  ;;  %v808_v57 = vadd.f32 %v776_v1, %v2976_v42  ;;  %v3079_v27 = vmul.f32 %v2552_v55, %v1137_v60  ;;  %v3091_v42 = vmul.f32 %v2534_v35, %v600_v41 }
 0x158   : > { %v1202_v24 = vadd.f32 %v2861_v15, %v1101_v32  ;;  %v569_v46 = vmax.f32 %v512_v54, 0.0  ;;  %v1431_v11 = vmin.f32 %v1399_v36, 6.0  ;;  %v972_v44 = vadd.f32 %v2813_v58, %v871_v21 }
 0x159   : > { %v3075_v47 = vmin.f32 %v582_v0, 6.0  ;;  %v3082_v15 = vmul.f32 %v2552_v55, %v1138_v59  ;;  %v3088_v0 = vmul.f32 %v2514_v16, %v708_v48  ;;  %v3101_v48 = vld [vmem:[%s3596_s2] ss:$0 sm:$0xff] }
 0x15a   : > { %v1267_v10 = vadd.f32 %v2968_v50, %v1202_v24  ;;  %v601_v13 = vmin.f32 %v569_v46, 6.0  ;;  %v1458_v28 = vpack.c.bf16 %v1431_v11, %v1430_v61  ;;  %v1037_v32 = vadd.f32 %v2884_v20, %v972_v44  ;;  %v546_v1 = vpop.f32.mrf.mxu2 }
 0x15b   : > { %686 = vst [vmem:[#allocation2 + $0x169] sm:$0xff] %v3075_v47  ;;  %v709_v58 = vld [vmem:[#allocation2 + $0xc0] sm:$0xff]  ;;  %v945_v50 = vmul.f32 %v2530_v33, %v600_v41  ;;  %v947_v24 = vmul.f32 %v2530_v33, %v2905_v63  ;;  %v547_v41 = vadd.f32 %v3101_v48, %v546_v1  ;;  %v3106_v63 = vmul.f32 %v2548_v49, %v1137_v60 }
 0x15c   : > { %v1332_v12 = vadd.f32 %v1300_v8, %v1267_v10  ;;  %673 = vst [vmem:[#allocation2 + $0xc9] sm:$0xff] %v601_v13  ;;  %1566 = vmatmul.bf16.gmra.mxu1 %v1458_v28  ;;  %v1102_v61 = vadd.f32 %v3007_v7, %v1037_v32  ;;  %v840_v21 = vmul.f32 %v2526_v30, %v709_v58 }
 0x15d   : > { %v746_v46 = vmul.f32 %v2514_v16, %v709_v58  ;;  %v3109_v8 = vmul.f32 %v2548_v49, %v1138_v59  ;;  %v777_v36 = vmul.f32 %v2518_v18, %v709_v58  ;;  %v583_v11 = vmax.f32 %v547_v41, 0.0 }
 0x15e   : > { %v1368_v20 = vadd.f32 %v2596_v43, %v1332_v12  ;;  %v1203_v7 = vadd.f32 %v2864_v51, %v1102_v61  ;;  %v872_v54 = vadd.f32 %v840_v21, %v3019_v14  ;;  %v1072_v44 = vmul.f32 %v2544_v45, %v601_v13  ;;  %v3670_v21 = vld [vmem:[#allocation16_spill] sm:$0xff] }
 0x15f   : > { %v811_v10 = vadd.f32 %v2876_v23, %v746_v46  ;;  %v948_v28 = vmul.f32 %v2530_v33, %v2912_v39  ;;  %v809_v32 = vadd.f32 %v777_v36, %v3030_v29  ;;  %v979_v51 = vadd.f32 %v947_v24, %v878_v3  ;;  %v3669_v24 = vld [vmem:[#allocation37_spill] sm:$0xff] }
 0x160   : > { %v1400_v17 = vmax.f32 %v1368_v20, 0.0  ;;  %v1268_v60 = vadd.f32 %v2971_v52, %v1203_v7  ;;  %v973_v59 = vadd.f32 %v2872_v62, %v872_v54  ;;  %v3121_v12 = vmin.f32 %v583_v11, 6.0  ;;  %v3671_v54 = vld [vmem:[#allocation31_spill] sm:$0xff]  ;;  %v3672_v36 = vld [vmem:[#allocation17_spill] sm:$0xff] }
 0x161   : > { %v876_v14 = vadd.f32 %v2995_v40, %v811_v10  ;;  %v946_v58 = vmul.f32 %v2530_v33, %v601_v13  ;;  %v1012_v61 = vmul.f32 %v2534_v35, %v2575_v25  ;;  %v1009_v52 = vmul.f32 %v2534_v35, %v601_v13 }
 0x162   : > { %v1333_v23 = vadd.f32 %v1301_v2, %v1268_v60  ;;  %v1432_v20 = vmin.f32 %v1400_v17, 6.0  ;;  %v1038_v39 = vadd.f32 %v2980_v56, %v973_v59  ;;  %687 = vst [vmem:[#allocation2 + $0x171] sm:$0xff] %v3121_v12  ;;  %v874_v1 = vadd.f32 %v3669_v24, %v809_v32  ;;  %v549_v56 = vpop.f32.mrf.mxu2  ;;  %v3673_v59 = vld [vmem:[#allocation26_spill] sm:$0xff] }
 0x163   : > { %v710_v62 = vld [vmem:[#allocation2 + $0xc8] sm:$0xff]  ;;  %v977_v3 = vadd.f32 %v945_v50, %v876_v14  ;;  %v980_v40 = vadd.f32 %v948_v28, %v3065_v26  ;;  %v1013_v41 = vmul.f32 %v2534_v35, %v3670_v21  ;;  %v1044_v7 = vadd.f32 %v1012_v61, %v979_v51 }
 0x164   : > { %v1139_v29 = vld [vmem:[#allocation2 + $0xc2] sm:$0xff]  ;;  %v1369_v25 = vadd.f32 %v2596_v43, %v1333_v23  ;;  %v841_v2 = vmul.f32 %v2526_v30, %v710_v62  ;;  %v1103_v46 = vadd.f32 %v1071_v53, %v1038_v39  ;;  %v747_v17 = vmul.f32 %v2514_v16, %v710_v62 }
 0x165   : > { %v1302_v13 = vmul.f32 %v2565_v6, %v1139_v29  ;;  %v1042_v50 = vadd.f32 %v3671_v54, %v977_v3  ;;  %v1077_v11 = vmul.f32 %v2544_v45, %v3672_v36  ;;  %v1176_v60 = vmul.f32 %v2548_v49, %v1139_v29  ;;  %v3674_v53 = vld [vmem:[#allocation33_spill] sm:$0xff] }
 0x166   : > { %v1401_v26 = vmax.f32 %v1369_v25, 0.0  ;;  %v873_v10 = vadd.f32 %v841_v2, %v808_v57  ;;  %v1204_v28 = vadd.f32 %v2983_v9, %v1103_v46  ;;  %v812_v32 = vadd.f32 %v3673_v59, %v747_v17  ;;  %v3675_v39 = vld [vmem:[#allocation29_spill] sm:$0xff] }
 0x167   : > { %v1107_v14 = vadd.f32 %v3674_v53, %v1042_v50  ;;  %v550_v51 = vadd.f32 %v3101_v48, %v549_v56  ;;  %v778_v61 = vmul.f32 %v2518_v18, %v710_v62  ;;  %v975_v21 = vadd.f32 %v3035_v37, %v874_v1  ;;  %v1140_v62 = vld [vmem:[#allocation2 + $0xca] sm:$0xff] }
 0x168   : > { %v1433_v23 = vmin.f32 %v1401_v26, 6.0  ;;  %v974_v3 = vadd.f32 %v3675_v39, %v873_v10  ;;  %v1269_v24 = vadd.f32 %v3079_v27, %v1204_v28  ;;  %v877_v57 = vadd.f32 %v2999_v38, %v812_v32  ;;  %v3676_v26 = vld [vmem:[#allocation35_spill] sm:$0xff]  ;;  %v3677_v27 = vld [vmem:[#allocation38_spill] sm:$0xff] }
 0x169   : > { %v1208_v9 = vadd.f32 %v1176_v60, %v1107_v14  ;;  %v584_v25 = vmax.f32 %v550_v51, 0.0  ;;  %v810_v2 = vadd.f32 %v778_v61, %v3088_v0  ;;  %v1040_v56 = vadd.f32 %v3091_v42, %v975_v21  ;;  %v3680_v51 = vld [vmem:[#allocation34_spill] sm:$0xff] }
 0x16a   : > { %v1459_v46 = vpack.c.bf16 %v1433_v23, %v1432_v20  ;;  %v1039_v17 = vadd.f32 %v3010_v31, %v974_v3  ;;  %v1334_v54 = vadd.f32 %v1302_v13, %v1269_v24  ;;  %v978_v50 = vadd.f32 %v946_v58, %v877_v57  ;;  %v551_v28 = vpop.f32.mrf.mxu2  ;;  %v3678_v20 = vld [vmem:[#allocation18_spill] sm:$0xff]  ;;  %v3679_v13 = vld [vmem:[#allocation32_spill] sm:$0xff] }
 0x16b   : > { %v1273_v10 = vadd.f32 %v3676_v26, %v1208_v9  ;;  %v3155_v59 = vmin.f32 %v584_v25, 6.0  ;;  %v875_v37 = vadd.f32 %v3677_v27, %v810_v2  ;;  %v1105_v0 = vadd.f32 %v3043_v19, %v1040_v56  ;;  %v3188_v26 = vld [vmem:[#allocation2 + $0x112] sm:$0xff] }
 0x16c   : > { %1571 = vmatmul.bf16.gmra.mxu1 %v1459_v46  ;;  %v1104_v38 = vadd.f32 %v1072_v44, %v1039_v17  ;;  %v1370_v1 = vadd.f32 %v2596_v43, %v1334_v54  ;;  %v1078_v31 = vmul.f32 %v2544_v45, %v3678_v20  ;;  %v1043_v42 = vadd.f32 %v3679_v13, %v978_v50  ;;  %v3682_v17 = vld [vmem:[#allocation36_spill] sm:$0xff] }
 0x16d   : > { %v1338_v58 = vadd.f32 %v3014_v4, %v1273_v10  ;;  %688 = vst [vmem:[#allocation2 + $0x181] sm:$0xff] %v3155_v59  ;;  %v552_v60 = vadd.f32 %v3101_v48, %v551_v28  ;;  %v976_v32 = vadd.f32 %v3039_v34, %v875_v37  ;;  %v1303_v53 = vmul.f32 %v2565_v6, %v1140_v62  ;;  %v3685_v10 = vld [vmem:[#allocation40_spill] sm:$0xff]  ;;  %v3686_v37 = vld [vmem:[#allocation43_spill] sm:$0xff] }
 0x16e   : > { %v1205_v44 = vadd.f32 %v2986_v22, %v1104_v38  ;;  %v1206_v14 = vadd.f32 %v3106_v63, %v1105_v0  ;;  %v1239_v19 = vmul.f32 %v2552_v55, %v1139_v29  ;;  %v1108_v61 = vadd.f32 %v3680_v51, %v1043_v42  ;;  %v3681_v29 = vld [vmem:[#allocation44_spill] sm:$0xff] }
 0x16f   : > { %v1177_v23 = vmul.f32 %v2548_v49, %v1140_v62  ;;  %v585_v39 = vmax.f32 %v552_v60, 0.0  ;;  %v1041_v4 = vadd.f32 %v1009_v52, %v976_v32  ;;  %v1374_v48 = vadd.f32 %v2596_v43, %v1338_v58  ;;  %v3688_v60 = vld [vmem:[#allocation45_spill] sm:$0xff] }
 0x170   : > { %v1270_v3 = vadd.f32 %v3082_v15, %v1205_v44  ;;  %v1271_v24 = vadd.f32 %v1239_v19, %v1206_v14  ;;  %v1045_v34 = vadd.f32 %v1013_v41, %v980_v40  ;;  %v1402_v21 = vmax.f32 %v1370_v1, 0.0  ;;  %v3183_v40 = vld [vmem:[#allocation2 + $0x10a] sm:$0xff]  ;;  %v3683_v41 = vld [vmem:[#allocation27_spill] sm:$0xff] }
 0x171   : > { %v1209_v22 = vadd.f32 %v1177_v23, %v1108_v61  ;;  %v3175_v57 = vmin.f32 %v585_v39, 6.0  ;;  %v1106_v63 = vadd.f32 %v3047_v5, %v1041_v4  ;;  %v1109_v2 = vadd.f32 %v1077_v11, %v1044_v7  ;;  %v3684_v7 = vld [vmem:[#allocation30_spill] sm:$0xff]  ;;  %v3687_v1 = vld [vmem:[#allocation41_spill] sm:$0xff]  ;;  %v3689_v23 = vld [vmem:[#allocation20_spill] sm:$0xff] }
 0x172   : > { %v1335_v9 = vadd.f32 %v1303_v53, %v1270_v3  ;;  %v1336_v25 = vadd.f32 %v3681_v29, %v1271_v24  ;;  %v1110_v46 = vadd.f32 %v1078_v31, %v1045_v34  ;;  %v1240_v52 = vmul.f32 %v2552_v55, %v1140_v62  ;;  %v3204_v61 = vld [vmem:[#allocation2 + $0x120] sm:$0xff]  ;;  %v3214_v24 = vld [vmem:[#allocation2 + $0x128] sm:$0xff] }
 0x173   : > { %v1274_v54 = vadd.f32 %v3682_v17, %v1209_v22  ;;  %689 = vst [vmem:[#allocation2 + $0x189] sm:$0xff] %v3175_v57  ;;  %v1207_v15 = vadd.f32 %v3109_v8, %v1106_v63  ;;  %v1178_v56 = vmul.f32 %v2548_v49, %v3683_v41  ;;  %v1406_v50 = vmax.f32 %v1374_v48, 0.0  ;;  %v3211_v3 = vld [vmem:[%s3598_s4] ss:$0 sm:$0xff]  ;;  %v3690_v34 = vld [vmem:[#allocation21_spill] sm:$0xff] }
 0x174   : > { %v1371_v5 = vadd.f32 %v2596_v43, %v1335_v9  ;;  %v1179_v11 = vmul.f32 %v2548_v49, %v3684_v7  ;;  %v1243_v27 = vmul.f32 %v2552_v55, %v3685_v10  ;;  %v1244_v28 = vmul.f32 %v2552_v55, %v3687_v1  ;;  %v3691_v9 = vld [vmem:[#allocation23_spill] sm:$0xff] }
 0x175   : > { %v1339_v8 = vadd.f32 %v3686_v37, %v1274_v54  ;;  %v1272_v38 = vadd.f32 %v1240_v52, %v1207_v15  ;;  %v1210_v62 = vadd.f32 %v1178_v56, %v1109_v2  ;;  %v1372_v31 = vadd.f32 %v2596_v43, %v1336_v25  ;;  %v3692_v25 = vld [vmem:[#allocation24_spill] sm:$0xff]  ;;  %v2016_v37 = vld [vmem:[#allocation2 + $0xf1] sm:$0xff] }
 0x176   : > { %v1403_v0 = vmax.f32 %v1371_v5, 0.0  ;;  %v1211_v13 = vadd.f32 %v1179_v11, %v1110_v46  ;;  %v1308_v42 = vmul.f32 %v2565_v6, %v3183_v40  ;;  %v1309_v53 = vmul.f32 %v2565_v6, %v3188_v26 }
 0x177   : > { %v1375_v58 = vadd.f32 %v2596_v43, %v1339_v8  ;;  %v1337_v32 = vadd.f32 %v3688_v60, %v1272_v38  ;;  %v1275_v44 = vadd.f32 %v1243_v27, %v1210_v62  ;;  %v1434_v14 = vmin.f32 %v1402_v21, 6.0  ;;  %v2017_v62 = vld [vmem:[#allocation2 + $0xf9] sm:$0xff] }
 0x178   : > { %v1435_v19 = vmin.f32 %v1403_v0, 6.0  ;;  %v1276_v51 = vadd.f32 %v1244_v28, %v1211_v13  ;;  %v750_v39 = vmul.f32 %v2514_v16, %v3689_v23  ;;  %v751_v21 = vmul.f32 %v2514_v16, %v3690_v34  ;;  %v3693_v60 = vld [vmem:[#allocation19_spill] sm:$0xff]  ;;  %v3244_v34 = vld [vmem:[#allocation2 + $0x140] sm:$0xff] }
 0x179   : > { %v1407_v4 = vmax.f32 %v1375_v58, 0.0  ;;  %v1373_v43 = vadd.f32 %v3211_v3, %v1337_v32  ;;  %v1340_v48 = vadd.f32 %v1308_v42, %v1275_v44  ;;  %v783_v29 = vmul.f32 %v2518_v18, %v3691_v9 }
 0x17a   : > { %v1460_v22 = vpack.c.bf16 %v1435_v19, %v1434_v14  ;;  %v1341_v63 = vadd.f32 %v1309_v53, %v1276_v51  ;;  %v784_v2 = vmul.f32 %v2518_v18, %v3692_v25  ;;  %v1438_v46 = vmin.f32 %v1406_v50, 6.0  ;;  %v3694_v19 = vld [vmem:[#allocation22_spill] sm:$0xff] }
 0x17b   : > { %v1439_v17 = vmin.f32 %v1407_v4, 6.0  ;;  %v1404_v54 = vmax.f32 %v1372_v31, 0.0  ;;  %v848_v15 = vmul.f32 %v2526_v30, %v3204_v61  ;;  %v1405_v52 = vmax.f32 %v1373_v43, 0.0 }
 0x17c   : > { %1576 = vmatmul.bf16.gmra.mxu1 %v1460_v22  ;;  %v815_v41 = vadd.f32 %v783_v29, %v750_v39  ;;  %v816_v56 = vadd.f32 %v784_v2, %v751_v21  ;;  %v849_v5 = vmul.f32 %v2526_v30, %v3214_v24  ;;  %v1376_v11 = vadd.f32 %v3211_v3, %v1340_v48  ;;  %v3242_v48 = vld [vmem:[#allocation2 + $0x138] sm:$0xff] }
 0x17d   : > { %v1462_v7 = vpack.c.bf16 %v1439_v17, %v1438_v46  ;;  %v1377_v27 = vadd.f32 %v3211_v3, %v1341_v63  ;;  %v949_v50 = vmul.f32 %v2016_v37, %v2530_v33  ;;  %v950_v28 = vmul.f32 %v2017_v62, %v2530_v33  ;;  %v3254_v46 = vld [vmem:[#allocation2 + $0x122] sm:$0xff] }
 0x17e   : > { %v880_v8 = vadd.f32 %v848_v15, %v815_v41  ;;  %v881_v38 = vadd.f32 %v849_v5, %v816_v56  ;;  %v1014_v0 = vmul.f32 %v2534_v35, %v3672_v36  ;;  %v1015_v31 = vmul.f32 %v2534_v35, %v3678_v20 }
 0x17f   : > { %1586 = vmatmul.bf16.vlgmr.msra.gmra.mxu3 %v1462_v7  ;;  %v1436_v13 = vmin.f32 %v1404_v54, 6.0  ;;  %v1079_v32 = vmul.f32 %v2544_v45, %v3693_v60  ;;  %v1437_v44 = vmin.f32 %v1405_v52, 6.0  ;;  %v1408_v53 = vmax.f32 %v1376_v11, 0.0 }
 0x180   : > { %v981_v42 = vadd.f32 %v949_v50, %v880_v8  ;;  %v982_v58 = vadd.f32 %v950_v28, %v881_v38  ;;  %v1409_v14 = vmax.f32 %v1377_v27, 0.0  ;;  %v1080_v51 = vmul.f32 %v2544_v45, %v3694_v19 }
 0x181   : > { %v1180_v4 = vmul.f32 %v2548_v49, %v3685_v10  ;;  %v1181_v43 = vmul.f32 %v2548_v49, %v3687_v1  ;;  %v1245_v21 = vmul.f32 %v2552_v55, %v3183_v40  ;;  %v1246_v22 = vmul.f32 %v2552_v55, %v3188_v26  ;;  %v3256_v1 = vld [vmem:[#allocation2 + $0x12a] sm:$0xff] }
 0x182   : > { %v1046_v23 = vadd.f32 %v1014_v0, %v981_v42  ;;  %v1047_v39 = vadd.f32 %v1015_v31, %v982_v58  ;;  %v752_v63 = vmul.f32 %v2514_v16, %v3691_v9  ;;  %v753_v29 = vmul.f32 %v2514_v16, %v3692_v25 }
 0x183   : > { %v785_v17 = vmul.f32 %v2518_v18, %v3204_v61  ;;  %v786_v54 = vmul.f32 %v2518_v18, %v3214_v24  ;;  %v850_v15 = vmul.f32 %v2526_v30, %v3242_v48  ;;  %v851_v9 = vmul.f32 %v2526_v30, %v3244_v34 }
 0x184   : > { %v1111_v10 = vadd.f32 %v1079_v32, %v1046_v23  ;;  %v1112_v2 = vadd.f32 %v1080_v51, %v1047_v39  ;;  %v951_v25 = vmul.f32 %v2530_v33, %v3672_v36  ;;  %v952_v52 = vmul.f32 %v2530_v33, %v3678_v20  ;;  %v3278_v32 = vld [vmem:[#allocation2 + $0x150] sm:$0xff] }
 0x185   : > { %v817_v5 = vadd.f32 %v785_v17, %v752_v63  ;;  %v818_v7 = vadd.f32 %v786_v54, %v753_v29  ;;  %v1440_v11 = vmin.f32 %v1408_v53, 6.0  ;;  %v1441_v27 = vmin.f32 %v1409_v14, 6.0  ;;  %v3280_v53 = vld [vmem:[#allocation2 + $0x158] sm:$0xff] }
 0x186   : > { %v1212_v41 = vadd.f32 %v1180_v4, %v1111_v10  ;;  %v1213_v56 = vadd.f32 %v1181_v43, %v1112_v2  ;;  %v1310_v37 = vmul.f32 %v2565_v6, %v3254_v46  ;;  %v1311_v50 = vmul.f32 %v2565_v6, %v3256_v1  ;;  %v3695_v4 = vld [vmem:[#allocation25_spill] sm:$0xff] }
 0x187   : > { %v882_v62 = vadd.f32 %v850_v15, %v817_v5  ;;  %v883_v28 = vadd.f32 %v851_v9, %v818_v7  ;;  %v1016_v36 = vmul.f32 %v2534_v35, %v3693_v60  ;;  %v1017_v20 = vmul.f32 %v2534_v35, %v3694_v19 }
 0x188   : > { %v1277_v8 = vadd.f32 %v1245_v21, %v1212_v41  ;;  %v1278_v38 = vadd.f32 %v1246_v22, %v1213_v56  ;;  %v1461_v0 = vpack.c.bf16 %v1437_v44, %v1436_v13  ;;  %v1463_v58 = vpack.c.bf16 %v1441_v27, %v1440_v11  ;;  %v3696_v13 = vld [vmem:[#allocation28_spill] sm:$0xff] }
 0x189   : > { %v983_v31 = vadd.f32 %v951_v25, %v882_v62  ;;  %v984_v42 = vadd.f32 %v952_v52, %v883_v28  ;;  %v754_v14 = vmul.f32 %v2514_v16, %v3204_v61  ;;  %v755_v51 = vmul.f32 %v2514_v16, %v3214_v24 }
 0x18a   : > { %v1342_v23 = vadd.f32 %v1310_v37, %v1277_v8  ;;  %v1343_v39 = vadd.f32 %v1311_v50, %v1278_v38  ;;  %v1081_v43 = vmul.f32 %v2544_v45, %v3695_v4  ;;  %v1082_v44 = vmul.f32 %v2544_v45, %v3696_v13  ;;  %v3310_v37 = vld [vmem:[#allocation2 + $0x13a] sm:$0xff]  ;;  %v3312_v50 = vld [vmem:[#allocation2 + $0x142] sm:$0xff] }
 0x18b   : > { %v1048_v21 = vadd.f32 %v1016_v36, %v983_v31  ;;  %v1049_v22 = vadd.f32 %v1017_v20, %v984_v42  ;;  %v787_v63 = vmul.f32 %v2518_v18, %v3242_v48  ;;  %v788_v61 = vmul.f32 %v2518_v18, %v3244_v34 }
 0x18c   : > { %1581 = vmatmul.bf16.gmra.mxu1 %v1461_v0  ;;  %v852_v24 = vmul.f32 %v2526_v30, %v3278_v32  ;;  %v853_v29 = vmul.f32 %v2526_v30, %v3280_v53  ;;  %v1378_v17 = vadd.f32 %v3211_v3, %v1342_v23  ;;  %v1182_v54 = vmul.f32 %v2548_v49, %v3183_v40  ;;  %v3697_v23 = vld [vmem:[#allocation39_spill] sm:$0xff] }
 0x18d   : > { %v819_v10 = vadd.f32 %v787_v63, %v754_v14  ;;  %v820_v2 = vadd.f32 %v788_v61, %v755_v51  ;;  %v1379_v15 = vadd.f32 %v3211_v3, %v1343_v39  ;;  %v1113_v9 = vadd.f32 %v1081_v43, %v1048_v21 }
 0x18e   : > { %v1114_v25 = vadd.f32 %v1082_v44, %v1049_v22  ;;  %v1183_v52 = vmul.f32 %v2548_v49, %v3188_v26  ;;  %v953_v5 = vmul.f32 %v2530_v33, %v3693_v60  ;;  %v954_v7 = vmul.f32 %v2530_v33, %v3694_v19  ;;  %v3319_v60 = vld [vmem:[%s3600_s6] ss:$0 sm:$0xff]  ;;  %v3698_v22 = vld [vmem:[#allocation42_spill] sm:$0xff] }
 0x18f   : > { %1591 = vmatmul.bf16.gmra.mxu3 %v1463_v58  ;;  %v884_v41 = vadd.f32 %v852_v24, %v819_v10  ;;  %v885_v56 = vadd.f32 %v853_v29, %v820_v2  ;;  %v1410_v11 = vmax.f32 %v1378_v17, 0.0  ;;  %v1247_v27 = vmul.f32 %v2552_v55, %v3254_v46  ;;  %v2018_v2 = vld [vmem:[%s2414_s15] sm:$0xff] }
 0x190   : > { %v1411_v40 = vmax.f32 %v1379_v15, 0.0  ;;  %v1214_v8 = vadd.f32 %v1182_v54, %v1113_v9  ;;  %v1215_v38 = vadd.f32 %v1183_v52, %v1114_v25  ;;  %v1248_v26 = vmul.f32 %v2552_v55, %v3256_v1  ;;  %v3343_v54 = vld [vmem:[#allocation2 + $0x168] sm:$0xff]  ;;  %v3345_v15 = vld [vmem:[#allocation2 + $0x170] sm:$0xff] }
 0x191   : > { %v985_v19 = vadd.f32 %v953_v5, %v884_v41  ;;  %v986_v62 = vadd.f32 %v954_v7, %v885_v56  ;;  %v1018_v28 = vmul.f32 %v2534_v35, %v3695_v4  ;;  %v1019_v36 = vmul.f32 %v2534_v35, %v3696_v13 }
 0x192   : > { %v1442_v20 = vmin.f32 %v1410_v11, 6.0  ;;  %v1312_v0 = vmul.f32 %v2565_v6, %v3310_v37  ;;  %v1313_v31 = vmul.f32 %v2565_v6, %v3312_v50  ;;  %v1443_v58 = vmin.f32 %v1411_v40, 6.0 }
 0x193   : > { %v1279_v14 = vadd.f32 %v1247_v27, %v1214_v8  ;;  %v1280_v51 = vadd.f32 %v1248_v26, %v1215_v38  ;;  %v1083_v39 = vmul.f32 %v2544_v45, %v3697_v23  ;;  %v1050_v44 = vadd.f32 %v1018_v28, %v985_v19  ;;  %v3367_v28 = vld [vmem:[#allocation2 + $0x152] sm:$0xff] }
 0x194   : > { %v1051_v21 = vadd.f32 %v1019_v36, %v986_v62  ;;  %v1084_v63 = vmul.f32 %v2544_v45, %v3698_v22  ;;  %v756_v61 = vmul.f32 %v2514_v16, %v3242_v48  ;;  %v757_v24 = vmul.f32 %v2514_v16, %v3244_v34  ;;  %v3369_v36 = vld [vmem:[#allocation2 + $0x15a] sm:$0xff] }
 0x195   : > { %v1547_v42 = vpop.f32.mrf.mxu1  ;;  %v789_v29 = vmul.f32 %v2518_v18, %v3278_v32  ;;  %v790_v10 = vmul.f32 %v2518_v18, %v3280_v53  ;;  %v1464_v9 = vpack.c.bf16 %v1443_v58, %v1442_v20  ;;  %v1344_v25 = vadd.f32 %v1312_v0, %v1279_v14  ;;  %v2019_v58 = vld [vmem:[%s2414_s15 + $0x8] sm:$0xff] }
 0x196   : > { %v1548_v43 = vadd.f32 %v3319_v60, %v1547_v42  ;;  %v1345_v52 = vadd.f32 %v1313_v31, %v1280_v51  ;;  %v1115_v48 = vadd.f32 %v1083_v39, %v1050_v44  ;;  %v1116_v34 = vadd.f32 %v1084_v63, %v1051_v21 }
 0x197   : > { %v1184_v41 = vmul.f32 %v2548_v49, %v3254_v46  ;;  %v1185_v56 = vmul.f32 %v2548_v49, %v3256_v1  ;;  %v821_v5 = vadd.f32 %v789_v29, %v756_v61  ;;  %v822_v7 = vadd.f32 %v790_v10, %v757_v24 }
 0x198   : > { %v1627_v17 = vadd.f32 %v2018_v2, %v1548_v43  ;;  %v854_v11 = vmul.f32 %v2526_v30, %v3343_v54  ;;  %v855_v27 = vmul.f32 %v2526_v30, %v3345_v15  ;;  %v1380_v8 = vadd.f32 %v3211_v3, %v1344_v25 }
 0x199   : > { %v1381_v38 = vadd.f32 %v3211_v3, %v1345_v52  ;;  %v1249_v46 = vmul.f32 %v2552_v55, %v3310_v37  ;;  %v1216_v26 = vadd.f32 %v1184_v41, %v1115_v48  ;;  %v1217_v19 = vadd.f32 %v1185_v56, %v1116_v34 }
 0x19a   : > { %1659 = vst [vmem:[%s3349_s9] sm:$0xff] %v1627_v17  ;;  %v1250_v62 = vmul.f32 %v2552_v55, %v3312_v50  ;;  %v886_v20 = vadd.f32 %v854_v11, %v821_v5  ;;  %v887_v0 = vadd.f32 %v855_v27, %v822_v7  ;;  %v955_v31 = vmul.f32 %v2530_v33, %v3695_v4  ;;  %v2020_v5 = vld [vmem:[%s2414_s15 + $0x10] sm:$0xff] }
 0x19b   : > { %v956_v42 = vmul.f32 %v2530_v33, %v3696_v13  ;;  %v1412_v51 = vmax.f32 %v1380_v8, 0.0  ;;  %v1413_v39 = vmax.f32 %v1381_v38, 0.0  ;;  %v1281_v43 = vadd.f32 %v1249_v46, %v1216_v26  ;;  %v725_v38 = vld [vmem:[#allocation2 + $0x180] sm:$0xff]  ;;  %v726_v46 = vld [vmem:[#allocation2 + $0x188] sm:$0xff] }
 0x19c   : > { %v1282_v44 = vadd.f32 %v1250_v62, %v1217_v19  ;;  %v1314_v21 = vmul.f32 %v2565_v6, %v3367_v28  ;;  %v1315_v63 = vmul.f32 %v2565_v6, %v3369_v36  ;;  %v987_v61 = vadd.f32 %v955_v31, %v886_v20 }
 0x19d   : > { %v1549_v40 = vpop.f32.mrf.mxu1  ;;  %v988_v24 = vadd.f32 %v956_v42, %v887_v0  ;;  %v1020_v4 = vmul.f32 %v2534_v35, %v3697_v23  ;;  %v1021_v13 = vmul.f32 %v2534_v35, %v3698_v22  ;;  %v1444_v10 = vmin.f32 %v1412_v51, 6.0 }
 0x19e   : > { %v1550_v1 = vadd.f32 %v3319_v60, %v1549_v40  ;;  %v1445_v2 = vmin.f32 %v1413_v39, 6.0  ;;  %v1347_v25 = vadd.f32 %v1315_v63, %v1282_v44  ;;  %v1085_v52 = vmul.f32 %v2544_v45, %v3075_v47  ;;  %v3415_v44 = vld [vmem:[#allocation2 + $0x172] sm:$0xff] }
 0x19f   : > { %1596 = vmatmul.bf16.gmra.mxu3 %v1464_v9  ;;  %v1346_v9 = vadd.f32 %v1314_v21, %v1281_v43  ;;  %v1052_v48 = vadd.f32 %v1020_v4, %v987_v61  ;;  %v1053_v34 = vadd.f32 %v1021_v13, %v988_v24  ;;  %v1086_v41 = vmul.f32 %v2544_v45, %v3121_v12  ;;  %v2021_v24 = vld [vmem:[%s2414_s15 + $0x18] sm:$0xff] }
 0x1a0   : > { %v1628_v14 = vadd.f32 %v2019_v58, %v1550_v1  ;;  %v758_v56 = vmul.f32 %v2514_v16, %v3278_v32  ;;  %v759_v11 = vmul.f32 %v2514_v16, %v3280_v53  ;;  %v791_v27 = vmul.f32 %v2518_v18, %v3343_v54 }
 0x1a1   : > { %v792_v40 = vmul.f32 %v2518_v18, %v3345_v15  ;;  %v1465_v8 = vpack.c.bf16 %v1445_v2, %v1444_v10  ;;  %v1382_v1 = vadd.f32 %v3211_v3, %v1346_v9  ;;  %v1383_v26 = vadd.f32 %v3211_v3, %v1347_v25 }
 0x1a2   : > { %1660 = vst [vmem:[%s3349_s9 + $0x8] sm:$0xff] %v1628_v14  ;;  %v1117_v32 = vadd.f32 %v1085_v52, %v1052_v48  ;;  %v1118_v19 = vadd.f32 %v1086_v41, %v1053_v34  ;;  %v1186_v53 = vmul.f32 %v2548_v49, %v3310_v37  ;;  %v1187_v62 = vmul.f32 %v2548_v49, %v3312_v50  ;;  %v3413_v50 = vld [vmem:[#allocation2 + $0x16a] sm:$0xff] }
 0x1a3   : > { %v823_v20 = vadd.f32 %v791_v27, %v758_v56  ;;  %v824_v0 = vadd.f32 %v792_v40, %v759_v11  ;;  %v856_v31 = vmul.f32 %v2526_v30, %v725_v38  ;;  %v857_v42 = vmul.f32 %v2526_v30, %v726_v46 }
 0x1a4   : > { %v1414_v51 = vmax.f32 %v1382_v1, 0.0  ;;  %v1251_v39 = vmul.f32 %v2552_v55, %v3367_v28  ;;  %v1252_v37 = vmul.f32 %v2552_v55, %v3369_v36  ;;  %v1415_v43 = vmax.f32 %v1383_v26, 0.0 }
 0x1a5   : > { %v1552_v29 = vpop.f32.mrf.mxu1  ;;  %v1218_v21 = vadd.f32 %v1186_v53, %v1117_v32  ;;  %v1219_v63 = vadd.f32 %v1187_v62, %v1118_v19  ;;  %v957_v61 = vmul.f32 %v2530_v33, %v3697_v23  ;;  %v888_v13 = vadd.f32 %v856_v31, %v823_v20 }
 0x1a6   : > { %v1553_v17 = vadd.f32 %v3319_v60, %v1552_v29  ;;  %v889_v29 = vadd.f32 %v857_v42, %v824_v0  ;;  %v958_v10 = vmul.f32 %v2530_v33, %v3698_v22  ;;  %v1316_v2 = vmul.f32 %v2565_v6, %v3413_v50 }
 0x1a7   : > { %v1446_v9 = vmin.f32 %v1414_v51, 6.0  ;;  %v1447_v25 = vmin.f32 %v1415_v43, 6.0  ;;  %v1283_v52 = vadd.f32 %v1251_v39, %v1218_v21  ;;  %v1284_v48 = vadd.f32 %v1252_v37, %v1219_v63  ;;  %v2023_v39 = vld [vmem:[#allocation2] sm:$0xff]  ;;  %v2024_v21 = vld [vmem:[%s2414_s15 + $0x28] sm:$0xff] }
 0x1a8   : > { %v1629_v7 = vadd.f32 %v2020_v5, %v1553_v17  ;;  %v1317_v17 = vmul.f32 %v2565_v6, %v3415_v44  ;;  %v989_v23 = vadd.f32 %v957_v61, %v888_v13  ;;  %v990_v34 = vadd.f32 %v958_v10, %v889_v29  ;;  %v1155_v61 = vld [vmem:[#allocation2 + $0x182] sm:$0xff] }
 0x1a9   : > { %v1022_v41 = vmul.f32 %v2534_v35, %v3075_v47  ;;  %v1023_v22 = vmul.f32 %v2534_v35, %v3121_v12  ;;  %v1348_v11 = vadd.f32 %v1316_v2, %v1283_v52  ;;  %v1087_v40 = vmul.f32 %v2544_v45, %v3155_v59 }
 0x1aa   : > { %1661 = vst [vmem:[%s3349_s9 + $0x10] sm:$0xff] %v1629_v7  ;;  %v1466_v7 = vpack.c.bf16 %v1447_v25, %v1446_v9  ;;  %v1349_v27 = vadd.f32 %v1317_v17, %v1284_v48  ;;  %v1088_v19 = vmul.f32 %v2544_v45, %v3175_v57  ;;  %v760_v53 = vmul.f32 %v2514_v16, %v3343_v54 }
 0x1ab   : > { %v1054_v26 = vadd.f32 %v1022_v41, %v989_v23  ;;  %v1055_v32 = vadd.f32 %v1023_v22, %v990_v34  ;;  %v761_v62 = vmul.f32 %v2514_v16, %v3345_v15  ;;  %v793_v20 = vmul.f32 %v2518_v18, %v725_v38  ;;  %v926_v34 = vld [vmem:[#allocation2 + $0x199] sm:$0xff]  ;;  %v927_v41 = vld [vmem:[#allocation2 + $0x1a1] sm:$0xff] }
 0x1ac   : > { %v794_v0 = vmul.f32 %v2518_v18, %v726_v46  ;;  %v1384_v31 = vadd.f32 %v3211_v3, %v1348_v11  ;;  %v1385_v42 = vadd.f32 %v3211_v3, %v1349_v27  ;;  %v1189_v54 = vmul.f32 %v2548_v49, %v3369_v36 }
 0x1ad   : > { %v1554_v58 = vpop.f32.mrf.mxu1  ;;  %v1120_v16 = vadd.f32 %v1088_v19, %v1055_v32  ;;  %v825_v15 = vadd.f32 %v793_v20, %v760_v53  ;;  %v858_v18 = vmul.f32 %v2023_v39, %v2526_v30  ;;  %v1253_v43 = vmul.f32 %v2552_v55, %v3413_v50 }
 0x1ae   : > { %v1555_v14 = vadd.f32 %v3319_v60, %v1554_v58  ;;  %v1119_v58 = vadd.f32 %v1087_v40, %v1054_v26  ;;  %v826_v38 = vadd.f32 %v794_v0, %v761_v62  ;;  %v1416_v37 = vmax.f32 %v1384_v31, 0.0  ;;  %v2026_v31 = vld [vmem:[%s2414_s15 + $0x38] sm:$0xff] }
 0x1af   : > { %1601 = vmatmul.bf16.gmra.mxu3 %v1465_v8  ;;  %v2022_v8 = vld [vmem:[%s2414_s15 + $0x20] sm:$0xff]  ;;  %v1417_v36 = vmax.f32 %v1385_v42, 0.0  ;;  %v960_v30 = vmul.f32 %v2530_v33, %v3121_v12  ;;  %v1221_v29 = vadd.f32 %v1189_v54, %v1120_v16  ;;  %v890_v10 = vadd.f32 %v858_v18, %v825_v15 }
 0x1b0   : > { %v1630_v4 = vadd.f32 %v2021_v24, %v1555_v14  ;;  %v1188_v14 = vmul.f32 %v2548_v49, %v3367_v28  ;;  %v1254_v28 = vmul.f32 %v2552_v55, %v3415_v44  ;;  %v959_v24 = vmul.f32 %v2530_v33, %v3075_v47 }
 0x1b1   : > { %v891_v2 = vadd.f32 %v858_v18, %v826_v38  ;;  %v1448_v17 = vmin.f32 %v1416_v37, 6.0  ;;  %v1318_v9 = vmul.f32 %v2565_v6, %v1155_v61  ;;  %v1449_v25 = vmin.f32 %v1417_v36, 6.0 }
 0x1b2   : > { %1662 = vst [vmem:[%s3349_s9 + $0x18] sm:$0xff] %v1630_v4  ;;  %v1156_v4 = vld [vmem:[#allocation2 + $0x18a] sm:$0xff]  ;;  %v1220_v13 = vadd.f32 %v1188_v14, %v1119_v58  ;;  %v1024_v48 = vmul.f32 %v2534_v35, %v3155_v59  ;;  %v1025_v47 = vmul.f32 %v2534_v35, %v3175_v57  ;;  %v1286_v23 = vadd.f32 %v1254_v28, %v1221_v29 }
 0x1b3   : > { %v1319_v52 = vmul.f32 %v2565_v6, %v1156_v4  ;;  %v991_v22 = vadd.f32 %v959_v24, %v890_v10  ;;  %v1467_v27 = vpack.c.bf16 %v1449_v25, %v1448_v17  ;;  %v1089_v40 = vmul.f32 %v2544_v45, %v926_v34  ;;  %v2027_v28 = vld [vmem:[%s2414_s15 + $0x40] sm:$0xff] }
 0x1b4   : > { %v1285_v12 = vadd.f32 %v1253_v43, %v1220_v13  ;;  %v1090_v59 = vmul.f32 %v2544_v45, %v927_v41  ;;  %v1190_v26 = vmul.f32 %v2548_v49, %v3413_v50  ;;  %v1191_v32 = vmul.f32 %v2548_v49, %v3415_v44  ;;  %v1157_v49 = vld [vmem:[#allocation2 + $0x19a] sm:$0xff]  ;;  %v1158_v44 = vld [vmem:[#allocation2 + $0x1a2] sm:$0xff] }
 0x1b5   : > { %v1557_v56 = vpop.f32.mrf.mxu1  ;;  %v1351_v35 = vadd.f32 %v1319_v52, %v1286_v23  ;;  %v1056_v57 = vadd.f32 %v1024_v48, %v991_v22  ;;  %v1255_v58 = vmul.f32 %v2552_v55, %v1155_v61  ;;  %v1256_v14 = vmul.f32 %v2552_v55, %v1156_v4  ;;  %v2028_v13 = vld [vmem:[%s2414_s15 + $0x48] sm:$0xff]  ;;  %v2029_v48 = vld [vmem:[%s2414_s15 + $0x50] sm:$0xff]  ;;  %v2030_v23 = vld [vmem:[%s2414_s15 + $0x58] sm:$0xff] }
 0x1b6   : > { %v1558_v5 = vadd.f32 %v3319_v60, %v1557_v56  ;;  %v992_v56 = vadd.f32 %v960_v30, %v891_v2  ;;  %v1320_v15 = vmul.f32 %v2565_v6, %v1157_v49  ;;  %v1321_v38 = vmul.f32 %v2565_v6, %v1158_v44 }
 0x1b7   : > { %v1387_v62 = vadd.f32 %v3211_v3, %v1351_v35  ;;  %v1121_v20 = vadd.f32 %v1089_v40, %v1056_v57  ;;  %v2033_v35 = vld [vmem:[%s2414_s15 + $0x80] sm:$0xff] }
 0x1b8   : > { %v1631_v1 = vadd.f32 %v2022_v8, %v1558_v5  ;;  %v1350_v8 = vadd.f32 %v1318_v9, %v1285_v12 }
 0x1b9   : > { %v1419_v54 = vmax.f32 %v1387_v62, 0.0 }
 0x1ba   : > { %1663 = vst [vmem:[%s3349_s9 + $0x20] sm:$0xff] %v1631_v1  ;;  %v1057_v1 = vadd.f32 %v1025_v47, %v992_v56  ;;  %v1386_v53 = vadd.f32 %v3211_v3, %v1350_v8  ;;  %v2031_v56 = vld [vmem:[%s2414_s15 + $0x60] sm:$0xff] }
 0x1bc   : > { %v1122_v45 = vadd.f32 %v1090_v59, %v1057_v1  ;;  %v1418_v50 = vmax.f32 %v1386_v53, 0.0  ;;  %v2032_v59 = vld [vmem:[%s2414_s15 + $0x68] sm:$0xff]  ;;  %v2034_v53 = vld [vmem:[%s2414_s15 + $0x70] sm:$0xff] }
 0x1bd   : > { %v1559_v51 = vpop.f32.mrf.mxu1 }
 0x1be   : > { %v1560_v46 = vadd.f32 %v3319_v60, %v1559_v51  ;;  %v1222_v51 = vadd.f32 %v1190_v26, %v1121_v20  ;;  %v1223_v16 = vadd.f32 %v1191_v32, %v1122_v45  ;;  %v1450_v18 = vmin.f32 %v1418_v50, 6.0  ;;  %v2035_v20 = vld [vmem:[%s2414_s15 + $0x88] sm:$0xff] }
 0x1bf   : > { %1606 = vmatmul.bf16.gmra.mxu3 %v1466_v7  ;;  %v2025_v7 = vld [vmem:[%s2414_s15 + $0x30] sm:$0xff] }
 0x1c0   : > { %v1632_v63 = vadd.f32 %v2024_v21, %v1560_v46  ;;  %v1451_v46 = vmin.f32 %v1419_v54, 6.0  ;;  %v1287_v37 = vadd.f32 %v1255_v58, %v1222_v51  ;;  %v1288_v43 = vadd.f32 %v1256_v14, %v1223_v16  ;;  %v2036_v14 = vld [vmem:[%s2414_s15 + $0x78] sm:$0xff]  ;;  %v2037_v54 = vld [vmem:[%s2414_s15 + $0x90] sm:$0xff] }
 0x1c1   : > { %v2038_v16 = vld [vmem:[%s2414_s15 + $0x98] sm:$0xff] }
 0x1c2   : > { %1664 = vst [vmem:[%s3349_s9 + $0x28] sm:$0xff] %v1632_v63  ;;  %v1468_v63 = vpack.c.bf16 %v1451_v46, %v1450_v18  ;;  %v1352_v36 = vadd.f32 %v1320_v15, %v1287_v37  ;;  %v1353_v61 = vadd.f32 %v1321_v38, %v1288_v43  ;;  %v2039_v18 = vld [vmem:[%s2414_s15 + $0xa0] sm:$0xff] }
 0x1c4   : > { %v1388_v6 = vadd.f32 %v3211_v3, %v1352_v36  ;;  %v1389_v30 = vadd.f32 %v3211_v3, %v1353_v61  ;;  %v2041_v36 = vld [vmem:[%s2414_s15 + $0xb0] sm:$0xff] }
 0x1c6   : > { %v1420_v10 = vmax.f32 %v1388_v6, 0.0  ;;  %v1421_v2 = vmax.f32 %v1389_v30, 0.0  ;;  %v2042_v30 = vld [vmem:[%s2414_s15 + $0xb8] sm:$0xff] }
 0x1c8   : > { %v1452_v9 = vmin.f32 %v1420_v10, 6.0  ;;  %v1453_v25 = vmin.f32 %v1421_v2, 6.0  ;;  %v2043_v10 = vld [vmem:[%s2414_s15 + $0xc0] sm:$0xff] }
 0x1c9   : > { %v1562_v33 = vpop.f32.mrf.mxu1 }
 0x1ca   : > { %v1563_v5 = vadd.f32 %v3319_v60, %v1562_v33  ;;  %v1469_v33 = vpack.c.bf16 %v1453_v25, %v1452_v9  ;;  %v2044_v25 = vld [vmem:[%s2414_s15 + $0xc8] sm:$0xff] }
 0x1cc   : > { %v1633_v11 = vadd.f32 %v2025_v7, %v1563_v5 }
 0x1ce   : > { %1665 = vst [vmem:[%s3349_s9 + $0x30] sm:$0xff] %v1633_v11 }
 0x1cf   : > { %1611 = vmatmul.bf16.gmra.mxu3 %v1467_v27 }
 0x1d1   : > { %v1564_v19 = vpop.f32.mrf.mxu1 }
 0x1d2   : > { %v1565_v0 = vadd.f32 %v3319_v60, %v1564_v19 }
 0x1d4   : > { %v1634_v42 = vadd.f32 %v2026_v31, %v1565_v0 }
 0x1d6   : > { %1666 = vst [vmem:[%s3349_s9 + $0x38] sm:$0xff] %v1634_v42 }
 0x1d9   : > { %v1567_v39 = vpop.f32.mrf.mxu1 }
 0x1da   : > { %v1568_v55 = vadd.f32 %v3319_v60, %v1567_v39 }
 0x1dc   : > { %v1635_v21 = vadd.f32 %v2027_v28, %v1568_v55  ;;  %v2040_v55 = vld [vmem:[%s2414_s15 + $0xa8] sm:$0xff] }
 0x1de   : > { %1667 = vst [vmem:[%s3349_s9 + $0x40] sm:$0xff] %v1635_v21 }
 0x1df   : > { %1616 = vmatmul.bf16.gmra.mxu3 %v1468_v63 }
 0x1e1   : > { %v1569_v24 = vpop.f32.mrf.mxu1 }
 0x1e2   : > { %v1570_v4 = vadd.f32 %v3319_v60, %v1569_v24 }
 0x1e4   : > { %v1636_v29 = vadd.f32 %v2028_v13, %v1570_v4 }
 0x1e6   : > { %1668 = vst [vmem:[%s3349_s9 + $0x48] sm:$0xff] %v1636_v29 }
 0x1e9   : > { %v1572_v17 = vpop.f32.mrf.mxu1 }
 0x1ea   : > { %v1573_v52 = vadd.f32 %v3319_v60, %v1572_v17 }
 0x1ec   : > { %v1637_v47 = vadd.f32 %v2029_v48, %v1573_v52 }
 0x1ee   : > { %1669 = vst [vmem:[%s3349_s9 + $0x50] sm:$0xff] %v1637_v47 }
 0x1ef   : > { %1621 = vmatmul.bf16.gmra.mxu3 %v1469_v33  ;;  %v2045_v33 = vld [vmem:[%s2414_s15 + $0xd0] sm:$0xff] }
 0x1f1   : > { %v1574_v3 = vpop.f32.mrf.mxu1 }
 0x1f2   : > { %v1575_v12 = vadd.f32 %v3319_v60, %v1574_v3 }
 0x1f4   : > { %v1638_v34 = vadd.f32 %v2030_v23, %v1575_v12 }
 0x1f6   : > { %1670 = vst [vmem:[%s3349_s9 + $0x58] sm:$0xff] %v1638_v34  ;;  %v2046_v34 = vld [vmem:[%s2414_s15 + $0xd8] sm:$0xff] }
 0x1f9   : > { %v1577_v41 = vpop.f32.mrf.mxu1 }
 0x1fa   : > { %v1578_v22 = vadd.f32 %v3319_v60, %v1577_v41 }
 0x1fc   : > { %v1639_v5 = vadd.f32 %v2031_v56, %v1578_v22 }
 0x1fe   : > { %1671 = vst [vmem:[%s3349_s9 + $0x60] sm:$0xff] %v1639_v5  ;;  %v2047_v5 = vld [vmem:[%s2414_s15 + $0xe0] sm:$0xff] }
 0x201   : > { %v1579_v7 = vpop.f32.mrf.mxu1 }
 0x202   : > { %v1580_v11 = vadd.f32 %v3319_v60, %v1579_v7  ;;  %v1587_v27 = vpop.f32.mrf.mxu3 }
 0x203   : > { %v1588_v40 = vadd.f32 %v3319_v60, %v1587_v27 }
 0x204   : > { %v1640_v8 = vadd.f32 %v2032_v59, %v1580_v11 }
 0x205   : > { %v1643_v57 = vadd.f32 %v2033_v35, %v1588_v40  ;;  %v2048_v40 = vld [vmem:[%s2414_s15 + $0xe8] sm:$0xff] }
 0x206   : > { %1672 = vst [vmem:[%s3349_s9 + $0x68] sm:$0xff] %v1640_v8 }
 0x207   : > { %1675 = vst [vmem:[%s3349_s9 + $0x80] sm:$0xff] %v1643_v57  ;;  %v2049_v57 = vld [vmem:[%s2414_s15 + $0xf0] sm:$0xff] }
 0x209   : > { %v1582_v1 = vpop.f32.mrf.mxu1 }
 0x20a   : > { %v1583_v26 = vadd.f32 %v3319_v60, %v1582_v1  ;;  %v1589_v32 = vpop.f32.mrf.mxu3 }
 0x20b   : > { %v1590_v19 = vadd.f32 %v3319_v60, %v1589_v32 }
 0x20c   : > { %v1641_v62 = vadd.f32 %v2034_v53, %v1583_v26 }
 0x20d   : > { %v1644_v45 = vadd.f32 %v2035_v20, %v1590_v19  ;;  %v2050_v19 = vld [vmem:[%s2414_s15 + $0xf8] sm:$0xff] }
 0x20e   : > { %1673 = vst [vmem:[%s3349_s9 + $0x70] sm:$0xff] %v1641_v62 }
 0x20f   : > { %1676 = vst [vmem:[%s3349_s9 + $0x88] sm:$0xff] %v1644_v45 }
 0x211   : > { %v1584_v0 = vpop.f32.mrf.mxu1 }
 0x212   : > { %v1585_v31 = vadd.f32 %v3319_v60, %v1584_v0  ;;  %v1592_v42 = vpop.f32.mrf.mxu3 }
 0x213   : > { %v1593_v58 = vadd.f32 %v3319_v60, %v1592_v42 }
 0x214   : > { %v1642_v50 = vadd.f32 %v2036_v14, %v1585_v31 }
 0x215   : > { %v1645_v49 = vadd.f32 %v2037_v54, %v1593_v58 }
 0x216   : > { %1674 = vst [vmem:[%s3349_s9 + $0x78] sm:$0xff] %v1642_v50 }
 0x217   : > { %1677 = vst [vmem:[%s3349_s9 + $0x90] sm:$0xff] %v1645_v49 }
 0x21a   : > { %v1594_v44 = vpop.f32.mrf.mxu3 }
 0x21b   : > { %v1595_v51 = vadd.f32 %v3319_v60, %v1594_v44 }
 0x21d   : > { %v1646_v15 = vadd.f32 %v2038_v16, %v1595_v51 }
 0x21f   : > { %1678 = vst [vmem:[%s3349_s9 + $0x98] sm:$0xff] %v1646_v15 }
 0x222   : > { %v1597_v38 = vpop.f32.mrf.mxu3 }
 0x223   : > { %v1598_v39 = vadd.f32 %v3319_v60, %v1597_v38 }
 0x225   : > { %v1647_v46 = vadd.f32 %v2039_v18, %v1598_v39 }
 0x227   : > { %1679 = vst [vmem:[%s3349_s9 + $0xa0] sm:$0xff] %v1647_v46 }
 0x22a   : > { %v1599_v37 = vpop.f32.mrf.mxu3 }
 0x22b   : > { %v1600_v43 = vadd.f32 %v3319_v60, %v1599_v37 }
 0x22d   : > { %v1648_v28 = vadd.f32 %v2040_v55, %v1600_v43 }
 0x22f   : > { %1680 = vst [vmem:[%s3349_s9 + $0xa8] sm:$0xff] %v1648_v28 }
 0x232   : > { %v1602_v21 = vpop.f32.mrf.mxu3 }
 0x233   : > { %v1603_v63 = vadd.f32 %v3319_v60, %v1602_v21 }
 0x235   : > { %v1649_v61 = vadd.f32 %v2041_v36, %v1603_v63 }
 0x237   : > { %1681 = vst [vmem:[%s3349_s9 + $0xb0] sm:$0xff] %v1649_v61 }
 0x23a   : > { %v1604_v24 = vpop.f32.mrf.mxu3 }
 0x23b   : > { %v1605_v6 = vadd.f32 %v3319_v60, %v1604_v24 }
 0x23d   : > { %v1650_v4 = vadd.f32 %v2042_v30, %v1605_v6 }
 0x23f   : > { %1682 = vst [vmem:[%s3349_s9 + $0xb8] sm:$0xff] %v1650_v4 }
 0x242   : > { %v1607_v13 = vpop.f32.mrf.mxu3 }
 0x243   : > { %v1608_v29 = vadd.f32 %v3319_v60, %v1607_v13 }
 0x245   : > { %v1651_v2 = vadd.f32 %v2043_v10, %v1608_v29 }
 0x247   : > { %1683 = vst [vmem:[%s3349_s9 + $0xc0] sm:$0xff] %v1651_v2 }
 0x24a   : > { %v1609_v17 = vpop.f32.mrf.mxu3 }
 0x24b   : > { %v1610_v9 = vadd.f32 %v3319_v60, %v1609_v17 }
 0x24d   : > { %v1652_v52 = vadd.f32 %v2044_v25, %v1610_v9 }
 0x24f   : > { %1684 = vst [vmem:[%s3349_s9 + $0xc8] sm:$0xff] %v1652_v52 }
 0x252   : > { %v1612_v48 = vpop.f32.mrf.mxu3 }
 0x253   : > { %v1613_v47 = vadd.f32 %v3319_v60, %v1612_v48 }
 0x255   : > { %v1653_v3 = vadd.f32 %v2045_v33, %v1613_v47 }
 0x257   : > { %1685 = vst [vmem:[%s3349_s9 + $0xd0] sm:$0xff] %v1653_v3 }
 0x25a   : > { %v1614_v12 = vpop.f32.mrf.mxu3 }
 0x25b   : > { %v1615_v23 = vadd.f32 %v3319_v60, %v1614_v12 }
 0x25d   : > { %v1654_v41 = vadd.f32 %v2046_v34, %v1615_v23 }
 0x25f   : > { %1686 = vst [vmem:[%s3349_s9 + $0xd8] sm:$0xff] %v1654_v41 }
 0x262   : > { %v1617_v22 = vpop.f32.mrf.mxu3 }
 0x263   : > { %v1618_v56 = vadd.f32 %v3319_v60, %v1617_v22 }
 0x265   : > { %v1655_v7 = vadd.f32 %v2047_v5, %v1618_v56 }
 0x267   : > { %1687 = vst [vmem:[%s3349_s9 + $0xe0] sm:$0xff] %v1655_v7 }
 0x26a   : > { %v1619_v11 = vpop.f32.mrf.mxu3 }
 0x26b   : > { %v1620_v27 = vadd.f32 %v3319_v60, %v1619_v11 }
 0x26d   : > { %v1656_v59 = vadd.f32 %v2048_v40, %v1620_v27 }
 0x26f   : > { %1688 = vst [vmem:[%s3349_s9 + $0xe8] sm:$0xff] %v1656_v59 }
 0x272   : > { %v1622_v8 = vpop.f32.mrf.mxu3 }
 0x273   : > { %v1623_v35 = vadd.f32 %v3319_v60, %v1622_v8 }
 0x275   : > { %v1657_v1 = vadd.f32 %v2049_v57, %v1623_v35 }
 0x277   : > { %1689 = vst [vmem:[%s3349_s9 + $0xf0] sm:$0xff] %v1657_v1 }
 0x27a   : > { %v1624_v26 = vpop.f32.mrf.mxu3 }
 0x27b   : > { %v1625_v32 = vadd.f32 %v3319_v60, %v1624_v26 }
 0x27d   : > { %v1658_v53 = vadd.f32 %v2050_v19, %v1625_v32 }
 0x27f   : > { %1690 = vst [vmem:[%s3349_s9 + $0xf8] sm:$0xff] %v1658_v53 }
 0x280   : > { %2198 = shalt.err (!%p2195_p10)
}
 0x281   : > { %s2255_s22 = smov 128   ;;  %s2256_s15 = smov 8  }
 0x282   : > { %1941 = dma.vmem_to_hbm [thread:$0]  (%p2380_p7), %s1705_s29, 4096, %s1707_s10, %s1692_s13, %s2255_s22, %s2255_s22, %s2256_s15  }
 0x283 PF: > { %s1721_s9 = sand.u32 1, %s2233_s24   ;;  %p3699_p12 = scmp.ge.s32.totalorder %s2245_s27, 2 }
 0x284   : > { %s1722_s1 = scalar_lea.sflag [#allocation5], %s1721_s9 }
 0x285   : > { %p1958_p13 = pnand %p3699_p12, %p2332_p6 }
 0x287   : > { %p1959_p0 = pneg %p1958_p13 }
 0x289   : > { %2228 = dma.done.wait (%p1959_p0), %s1722_s1, 4096  }
 0x28a   : > { %2230 = vsyncadd (%p1959_p0), %s1722_s1, 4294963200  ;;  %p22_p3 = scmp.ge.s32.totalorder %s2364_s11, 4   ;;  %s3700_s24 = smov %s2237_s25 }
 0x28b   : > { %s3701_s25 = smov %s2241_s26  ;;  %s3702_s26 = smov %s2376_s17 }
 0x28c   : > { %s3703_s27 = smov %s2364_s11  ;;  %24 = sbr.rel (!%p22_p3) target bundleno = 9 (0x9), region = 107 }
 0x291   :  { %1728 = vsyncpa [#allocation4], 1 }
 0x292   :  { %1730 = vsyncpa [#allocation4 + $0x1], 1 }
 0x293   :  { %1731 = vsyncpa [#allocation7], 1 }
 0x294   :  { %1732 = vsyncpa [#allocation10], 1 }
 0x295   :  { %1733 = vsyncpa [#allocation5], 1 }
 0x296   :  { %1735 = vsyncpa [#allocation5 + $0x1], 1 }

</bundles_post_ra>
